<compile_context>
chip_gen: v6e
topology: v6e:2x2x1
jax: 0.10.0
libtpu: 0.0.40
codegen_flags: <defaults>
</compile_context>

<pallas_src>
import functools
import math

import jax
import jax.numpy as jnp
from jax.experimental import pallas as pl
from jax.experimental.pallas import tpu as pltpu


def _round_up(x, m):
    return ((x + m - 1) // m) * m


def _vmem_capacity_bytes():
    """Physical VMEM per core; conservative fallback if the query is unavailable."""
    try:
        return int(pltpu.get_tpu_info().vmem_capacity_bytes)
    except Exception:
        return 64 * 1024 * 1024   # v7x per-TC size — safe lower bound everywhere


def _choose_tile_rows(n, f_pad, ew_bytes, h_bytes, max_tile_rows):
    """Largest row tile whose footprint fits the derived VMEM budget.

    Accounts for the resident h / f2 blocks (constant index_map; conservatively
    assumed double-buffered), the double-buffered int8 adjacency and fp32 output
    tiles, and the (TM, N) softmax temporaries.  Returns (tile_rows, vmem_limit).
    """
    cap = _vmem_capacity_bytes()
    budget = int(cap * 0.75)                 # ~96 MiB on v5e/v6e, ~48 MiB on v7x
    headroom = 4 * 1024 * 1024               # compiler scratch / spills

    resident = 2 * (n * f_pad * h_bytes      # h (revisited every step)
                    + n * 4)                 # f2 row (fp32)

    per_row = (2 * n * 1                     # int8 adjacency tile, double-buffered
               + 2 * 4                       # f1 column, double-buffered
               + 2 * f_pad * 4               # fp32 output tile, double-buffered
               + 3 * n * ew_bytes            # e / att / p (TM, N) temporaries
               + n                           # bool mask
               + f_pad * 4)                  # fp32 matmul accumulator

    avail = budget - resident - headroom
    tm = avail // max(per_row, 1)
    tm = int(min(tm, max_tile_rows, n))
    if tm < n:
        tm = max(32, (tm // 32) * 32)        # int8 sublane packing: multiple of 32
        tm = min(tm, n)
    else:
        tm = n

    footprint = resident + tm * per_row + headroom
    vmem_limit = int(min(cap, max(footprint, 32 * 1024 * 1024)))
    return tm, vmem_limit


def gat_row_kernel(adj_ref, f1_ref, f2_ref, h_ref, out_ref, *,
                   alpha, concat, approx_recip, ew_dtype):
    ew = ew_dtype

    # e = leakyrelu(f1 + f2^T) for this row tile -> (TM, N), in the elementwise
    # dtype (fp32, or bf16 on v6e/v7x for 2x VPU/EUP throughput).
    f1 = f1_ref[...].astype(ew)              # (TM, 1)
    f2 = f2_ref[...].astype(ew)              # (1, N), already transposed
    e = f1 + f2
    e = jnp.where(e > 0, e, e * jnp.asarray(alpha, dtype=ew))

    # masked fill + numerically-stable exp.  int8 adjacency compared directly
    # (no widening pass); -9e15 is representable in bf16 (same exponent range).
    mask = adj_ref[...] != 0
    att = jnp.where(mask, e, jnp.asarray(-9.0e15, dtype=ew))
    att = att - jnp.max(att, axis=1, keepdims=True)
    p = jnp.exp(att)                          # (TM, N), unnormalized

    # fp32 row denominator (kept out of the low-precision path).
    denom = jnp.sum(p, axis=1, keepdims=True, dtype=jnp.float32)   # (TM, 1)

    # TODO(synk): F.dropout on the attention matrix is identity in eval mode
    # (training=False); training-mode stochastic dropout is not implemented.

    # MXU matmul on the UNNORMALIZED weights; fp32 accumulation.  Normalization
    # is applied afterwards on the much smaller (TM, f_pad) result.
    h = h_ref[...]
    out = jnp.dot(p.astype(h.dtype), h, preferred_element_type=jnp.float32)
    out = out * pl.reciprocal(denom, approx=approx_recip)

    if concat:
        # fused F.elu epilogue; numerically-safe expm1 (quadratic near 0 avoids
        # the exp(x)-1 cancellation flagged in review).
        neg = jnp.minimum(out, 0.0)
        em1 = jnp.where(jnp.abs(neg) < 1e-3,
                        neg + 0.5 * neg * neg,
                        jnp.exp(neg) - 1.0)
        out = jnp.where(out > 0, out, em1)

    out_ref[...] = out.astype(out_ref.dtype)


def graph_attention_forward(x, adj, W, a1, a2, *, alpha=0.2, concat=False,
                            dropout=0.0, matmul_dtype=None,
                            elementwise_dtype=jnp.float32,
                            approx_reciprocal=True, max_tile_rows=1024,
                            dimension_semantics=("parallel",)):
    """Forward pass of the GraphAttention module (eval mode).

    matmul_dtype:      dtype of the attention @ h MXU operands (None -> fp32).
    elementwise_dtype: dtype of the (TM, N) leaky-relu / mask / exp chain.
                       Use jnp.bfloat16 on v6e/v7x; keep fp32 on v5e.
    """
    del dropout  # identity in eval mode; see TODO in the kernel
    x = x.astype(jnp.float32)
    W = W.astype(jnp.float32)
    n, _ = x.shape
    f_out = W.shape[1]
    f_pad = _round_up(f_out, 128)            # lane-dense h / output last dim
    hp = jax.lax.Precision.HIGHEST

    # int8 adjacency mask: the kernel only needs adj > 0 (4x less HBM traffic).
    if adj.dtype != jnp.int8:
        adj = (adj > 0).astype(jnp.int8)

    # Hoisted tiny projections, computed once outside the row-tiled kernel.
    h = jnp.dot(x, W, precision=hp)                                    # (N, f_out)
    f1 = jnp.dot(h, a1.reshape(f_out, 1), precision=hp)                # (N, 1)
    f2 = jnp.dot(h, a2.reshape(f_out, 1), precision=hp).reshape(1, n)  # (1, N)
    h_pad = jnp.pad(h, ((0, 0), (0, f_pad - f_out)))                   # (N, f_pad)
    if matmul_dtype is not None:
        h_pad = h_pad.astype(matmul_dtype)

    ew_bytes = jnp.dtype(elementwise_dtype).itemsize
    h_bytes = jnp.dtype(h_pad.dtype).itemsize
    tm, vmem_limit = _choose_tile_rows(n, f_pad, ew_bytes, h_bytes, max_tile_rows)
    grid = (pl.cdiv(n, tm),)

    kernel = functools.partial(
        gat_row_kernel, alpha=float(alpha), concat=bool(concat),
        approx_recip=bool(approx_reciprocal), ew_dtype=elementwise_dtype)

    out = pl.pallas_call(
        kernel,
        out_shape=jax.ShapeDtypeStruct((n, f_pad), jnp.float32),
        grid_spec=pltpu.PrefetchScalarGridSpec(
            num_scalar_prefetch=0,
            grid=grid,
            in_specs=[
                pl.BlockSpec((tm, n), lambda i: (i, 0)),      # adj row tile (int8)
                pl.BlockSpec((tm, 1), lambda i: (i, 0)),      # f1 = h @ a1 row tile
                pl.BlockSpec((1, n), lambda i: (0, 0)),       # f2 = (h @ a2)^T (resident)
                pl.BlockSpec((n, f_pad), lambda i: (0, 0)),   # h (resident, revisited)
            ],
            out_specs=pl.BlockSpec((tm, f_pad), lambda i: (i, 0)),
        ),
        compiler_params=pltpu.CompilerParams(
            # independent row tiles; use pltpu.CORE_PARALLEL here on v7x.
            dimension_semantics=dimension_semantics,
            vmem_limit_bytes=vmem_limit,
        ),
    )(adj, f1, f2, h_pad)

    return out[:, :f_out]


def xavier_normal(key, shape, gain):
    fan_in, fan_out = shape
    std = gain * math.sqrt(2.0 / (fan_in + fan_out))
    return std * jax.random.normal(key, shape, dtype=jnp.float32)


def reference_forward(x, adj, W, a1, a2, alpha=0.2, concat=False):
    hp = jax.lax.Precision.HIGHEST
    h = jnp.dot(x, W, precision=hp)
    f1 = jnp.dot(h, a1, precision=hp)
    f2 = jnp.dot(h, a2, precision=hp)
    e = f1 + f2.T
    e = jnp.where(e > 0, e, alpha * e)
    att = jnp.where(adj > 0, e, -9.0e15)
    att = jax.nn.softmax(att, axis=1)
    out = jnp.dot(att, h, precision=hp)
    if concat:
        out = jnp.where(out > 0, out, jnp.expm1(out))
    return out


if __name__ == "__main__":
    N, in_features, out_features = 256, 16, 8
    alpha = 0.2
    gain = math.sqrt(2.0)

    key = jax.random.PRNGKey(0)
    kx, kadj, kw, ka1, ka2 = jax.random.split(key, 5)

    x = jax.random.normal(kx, (N, in_features), dtype=jnp.float32)
    adj_f = (jax.random.uniform(kadj, (N, N)) > 0.6).astype(jnp.float32)
    adj_f = jnp.maximum(adj_f, jnp.eye(N, dtype=jnp.float32))   # self-loops
    adj_i8 = adj_f.astype(jnp.int8)       # caller passes the int8 mask directly

    W = xavier_normal(kw, (in_features, out_features), gain)
    a1 = xavier_normal(ka1, (out_features, 1), gain)
    a2 = xavier_normal(ka2, (out_features, 1), gain)

    ref = reference_forward(x, adj_f, W, a1, a2, alpha=alpha, concat=False)
    ref_elu = reference_forward(x, adj_f, W, a1, a2, alpha=alpha, concat=True)

    # 1) exact path: fp32 everywhere, exact reciprocal; forces 2 row tiles of 128
    #    to exercise the tiled / revisited-h pipeline.
    out = graph_attention_forward(x, adj_i8, W, a1, a2, alpha=alpha,
                                  concat=False, approx_reciprocal=False,
                                  max_tile_rows=128)
    out = jax.block_until_ready(out)
    assert out.shape == (N, out_features)
    assert jnp.allclose(out, ref, atol=1e-3, rtol=1e-3), \
        float(jnp.max(jnp.abs(out - ref)))

    # 2) bf16 MXU operands (v5e-friendly: softmax/elementwise stays fp32),
    #    approximate EUP reciprocal, single VMEM-budget-derived row tile.
    out2 = graph_attention_forward(x, adj_i8, W, a1, a2, alpha=alpha,
                                   concat=False, matmul_dtype=jnp.bfloat16,
                                   approx_reciprocal=True)
    out2 = jax.block_until_ready(out2)
    assert jnp.allclose(out2, ref, atol=5e-2, rtol=5e-2), \
        float(jnp.max(jnp.abs(out2 - ref)))

    # 3) fast v6e/v7x path: bf16 elementwise/softmax + bf16 MXU operands +
    #    approximate reciprocal + fused ELU epilogue (denominator stays fp32).
    out3 = graph_attention_forward(x, adj_i8, W, a1, a2, alpha=alpha,
                                   concat=True, matmul_dtype=jnp.bfloat16,
                                   elementwise_dtype=jnp.bfloat16,
                                   approx_reciprocal=True)
    out3 = jax.block_until_ready(out3)
    assert jnp.allclose(out3, ref_elu, atol=1e-1, rtol=1e-1), \
        float(jnp.max(jnp.abs(out3 - ref_elu)))

    print("KERNEL_OK")
</pallas_src>

<mosaic_0001>
module attributes {stable_mosaic.version = 11 : i64} {
  func.func @gat_row_kernel(%arg0: i32, %arg1: memref<128x256xi8, #tpu.memory_space<vmem>>, %arg2: memref<128x1xf32, #tpu.memory_space<vmem>>, %arg3: memref<1x256xf32, #tpu.memory_space<vmem>>, %arg4: memref<256x128xf32, #tpu.memory_space<vmem>>, %arg5: memref<128x128xf32, #tpu.memory_space<vmem>>) attributes {dimension_semantics = [#tpu.dimension_semantics<parallel>], iteration_bounds = array<i64: 2>, scalar_prefetch = 0 : i64, scratch_operands = 0 : i64, tpu.core_type = #tpu.core_type<tc>, window_params = [{transform_indices = @transform_0, window_bounds = array<i64: 128, 256>}, {transform_indices = @transform_1, window_bounds = array<i64: 128, 1>}, {pipeline_mode = #tpu.pipeline_mode<synchronous>, transform_indices = @transform_2, window_bounds = array<i64: 1, 256>}, {pipeline_mode = #tpu.pipeline_mode<synchronous>, transform_indices = @transform_3, window_bounds = array<i64: 256, 128>}, {transform_indices = @transform_4, window_bounds = array<i64: 128, 128>}]} {
    %c0 = arith.constant 0 : index
    %c0_0 = arith.constant 0 : index
    %0 = vector.load %arg2[%c0, %c0_0] : memref<128x1xf32, #tpu.memory_space<vmem>>, vector<128x1xf32>
    %c0_1 = arith.constant 0 : index
    %c0_2 = arith.constant 0 : index
    %1 = vector.load %arg3[%c0_1, %c0_2] : memref<1x256xf32, #tpu.memory_space<vmem>>, vector<1x256xf32>
    %2 = vector.broadcast %0 : vector<128x1xf32> to vector<128x256xf32>
    %3 = vector.broadcast %1 : vector<1x256xf32> to vector<128x256xf32>
    %4 = arith.addf %2, %3 : vector<128x256xf32>
    %cst = arith.constant 0.000000e+00 : f32
    %5 = vector.broadcast %cst : f32 to vector<128x256xf32>
    %6 = arith.cmpf ogt, %4, %5 : vector<128x256xf32>
    %cst_3 = arith.constant 2.000000e-01 : f32
    %7 = vector.broadcast %cst_3 : f32 to vector<128x256xf32>
    %8 = arith.mulf %4, %7 : vector<128x256xf32>
    %9 = arith.select %6, %4, %8 : vector<128x256xi1>, vector<128x256xf32>
    %c0_4 = arith.constant 0 : index
    %c0_5 = arith.constant 0 : index
    %10 = vector.load %arg1[%c0_4, %c0_5] : memref<128x256xi8, #tpu.memory_space<vmem>>, vector<128x256xi8>
    %c0_i8 = arith.constant 0 : i8
    %11 = vector.broadcast %c0_i8 : i8 to vector<128x256xi8>
    %12 = arith.cmpi ne, %10, %11 : vector<128x256xi8>
    %cst_6 = arith.constant -9.000000e+15 : f32
    %13 = vector.broadcast %cst_6 : f32 to vector<128x256xf32>
    %14 = arith.select %12, %9, %13 : vector<128x256xi1>, vector<128x256xf32>
    %cst_7 = arith.constant dense<0xFF800000> : vector<128xf32>
    %15 = vector.multi_reduction <maximumf>, %14, %cst_7 [1] : vector<128x256xf32> to vector<128xf32>
    %16 = vector.shape_cast %15 : vector<128xf32> to vector<128x1xf32>
    %17 = vector.broadcast %16 : vector<128x1xf32> to vector<128x256xf32>
    %18 = arith.subf %14, %17 : vector<128x256xf32>
    %19 = math.exp %18 : vector<128x256xf32>
    %cst_8 = arith.constant dense<0.000000e+00> : vector<128xf32>
    %20 = vector.multi_reduction <add>, %19, %cst_8 [1] : vector<128x256xf32> to vector<128xf32>
    %21 = vector.shape_cast %20 : vector<128xf32> to vector<128x1xf32>
    %c0_9 = arith.constant 0 : index
    %c0_10 = arith.constant 0 : index
    %22 = vector.load %arg4[%c0_9, %c0_10] : memref<256x128xf32, #tpu.memory_space<vmem>>, vector<256x128xf32>
    %cst_11 = arith.constant dense<0.000000e+00> : vector<128x128xf32>
    %23 = tpu.matmul %19, %22, %cst_11 {dimension_numbers = #tpu.dot_dimension_numbers<[1], [0], [0], [1], [0, 0, 1, 1], [], []>} : vector<128x256xf32>, vector<256x128xf32>, vector<128x128xf32> -> vector<128x128xf32>
    %24 = tpu.reciprocal %21 : vector<128x1xf32> -> vector<128x1xf32>
    %25 = vector.broadcast %24 : vector<128x1xf32> to vector<128x128xf32>
    %26 = arith.mulf %23, %25 : vector<128x128xf32>
    %c0_12 = arith.constant 0 : index
    %c0_13 = arith.constant 0 : index
    %27 = vector.load %arg5[%c0_12, %c0_13] : memref<128x128xf32, #tpu.memory_space<vmem>>, vector<128x128xf32>
    tpu.vector_store %arg5[%c0_12, %c0_13], %26 {strides = array<i32>} : memref<128x128xf32, #tpu.memory_space<vmem>>, vector<128x128xf32>,
    return
  }
  func.func @transform_0(%arg0: i32) -> (i32, i32) {
    %c0_i32 = arith.constant 0 : i32
    %c0_i32_0 = arith.constant 0 : i32
    return %arg0, %c0_i32 : i32, i32
  }
  func.func @transform_1(%arg0: i32) -> (i32, i32) {
    %c0_i32 = arith.constant 0 : i32
    %c0_i32_0 = arith.constant 0 : i32
    return %arg0, %c0_i32 : i32, i32
  }
  func.func @transform_2(%arg0: i32) -> (i32, i32) {
    %c0_i32 = arith.constant 0 : i32
    %c0_i32_0 = arith.constant 0 : i32
    %c0_i32_1 = arith.constant 0 : i32
    return %c0_i32, %c0_i32_0 : i32, i32
  }
  func.func @transform_3(%arg0: i32) -> (i32, i32) {
    %c0_i32 = arith.constant 0 : i32
    %c0_i32_0 = arith.constant 0 : i32
    %c0_i32_1 = arith.constant 0 : i32
    return %c0_i32, %c0_i32_0 : i32, i32
  }
  func.func @transform_4(%arg0: i32) -> (i32, i32) {
    %c0_i32 = arith.constant 0 : i32
    %c0_i32_0 = arith.constant 0 : i32
    return %arg0, %c0_i32 : i32, i32
  }
}

</mosaic_0001>

<bundles_post_ra>
// kernel: tpu_custom_call.1
= control target key start
LH: loop header
LB: loop body
LE: loop exit
PB: predicated region body
PF: predicated region fallthrough
CT: control target
= control target key end

     0   :  { %9 = vsyncpa [#allocation3], 0  ;;  %s2643_s0 = inlined_call_operand.hbm [shape: s8[256,256], index: 0, kind: input, shape index: {}]   ;;  %s2644_s1 = inlined_call_operand.vmem [shape: f32[256,1], index: 1, kind: input, shape index: {}]   ;;  %s2645_s2 = inlined_call_operand.vmem [shape: f32[1,256], index: 2, kind: input, shape index: {}]   ;;  %s2646_s3 = inlined_call_operand.vmem [shape: f32[256,128], index: 3, kind: input, shape index: {}]   ;;  %s2647_s4 = inlined_call_operand.hbm [shape: f32[256,128], index: 4, kind: output, shape index: {}]  }
   0x1   :  { %11 = vsyncpa [#allocation3 + $0x1], 0 }
   0x2   :  { %12 = vsyncpa [#allocation4], 0 }
   0x3   :  { %14 = vsyncpa [#allocation4 + $0x1], 0  ;;  %s1618_s15 = smov 0   ;;  %s1620_s16 = smov 0  }
   0x4   :  { %s1622_s17 = smov 0   ;;  %s1624_s18 = smov 0  }
   0x5 LB: > { %s1639_s19 = sadd.s32 4294967295, %s1584_s18   ;;  %s1211_s20 = sadd.s32 4294967294, %s1584_s18   ;;  %s1584_s18 = sphi %s1624_s18, %s2756_s18   ;;  %s1580_s17 = sphi %s1622_s17, %s2755_s17   ;;  %s1576_s16 = sphi %s1620_s16, %s2754_s16   ;;  %s1572_s15 = sphi %s1618_s15, %s2753_s15  }
   0x6   : > { %s1643_s21 = sadd.s32 1, %s1584_s18   ;;  %s27_s22 = sadd.s32 1, %s1580_s17 }
   0x7   : > { %s24_s23 = ssub.s32 %s1584_s18, %s1643_s21  ;;  %p34_p0 = scmp.ne.s32.totalorder %s1580_s17, %s1576_s16 }
   0x8   : > { %p25_p1 = scmp.eq.s32.totalorder %s24_s23, 0  ;;  %p35_p2 = scmp.eq.s32.totalorder %s1584_s18, 0 }
   0x9   : > { %p40_p3 = scmp.ne.s32.totalorder %s1576_s16, %s1572_s15  ;;  %p41_p4 = scmp.eq.s32.totalorder %s1639_s19, 0 }
   0xa   : > { %s1655_s24 = scalar_select %p25_p1, %s1580_s17, %s27_s22  }
   0xb   : > { %p1657_p5 = por %p35_p2, %p34_p0  ;;  %p1661_p6 = por %p41_p4, %p40_p3 }
   0xc   : > { %p132_p7 = scmp.eq.s32.totalorder %s1639_s19, 1  ;;  %p138_p8 = scmp.eq.s32.totalorder %s1211_s20, 1 }
   0xd   : > { %s2655_s26 = scalar_select %p1661_p6, 1, 0 }
   0xe   : > { %p1355_p10 = scmp.lt.s32.totalorder %s1584_s18, 2  ;;  %p1668_p11 = por %p132_p7, %p34_p0 }
   0xf   : > { %p1672_p12 = por %p138_p8, %p40_p3  ;;  %s164_s29 = sand.u32 1, %s1580_s17  }
  0x10   : > { %s2656_s27 = scalar_select %p1668_p11, 1, 0 }
  0x11   : > { %s2657_s28 = scalar_select %p1672_p12, 1, 0 }
  0x12   : > { %s1229_s30 = sshll.u32 %s1584_s18, 10  ;;  %s1214_s5 = sshll.u32 %s164_s29, 6 }
  0x13   : > { %s1681_s8 = scalar_lea.hbm %s2643_s0, %s1229_s30  ;;  %s168_s9 = scalar_lea.vmem [#allocation2], %s1214_s5 }
  0x14   : > { %s176_s10 = sshll.u32 %s168_s9, 4  ;;  %p1685_p13 = pnand %p1355_p10, %p1657_p5  ;;  %s1689_s10 = int_to_ptr.vmem [resolvable:$true] %s176_s10 }
  0x15   : > { %s1691_s12 = scalar_lea.sflag [#allocation3], %s164_s29  ;;  %s1492_s13 = scalar_lea.hbm %s1681_s8, 1024 }
  0x16   : > { %p1493_p0 = scmp.ne.s32.totalorder %s1681_s8, %s1492_s13  ;;  %p1494_p1 = pneg %p1685_p13 }
  0x17   : > { %s1497_s22 = scalar_lea.hbm %s2643_s0, 2048  ;;  %p1498_p4 = scmp.lt.s32.totalorder %s1681_s8, %s2643_s0 }
  0x18   : > { %p1495_p2 = pnand %p1494_p1, %p1493_p0  ;;  %p1499_p5 = scmp.lt.s32.totalorder %s1497_s22, %s1492_s13 }
  0x1a   : > { %p1496_p3 = pneg %p1495_p2  ;;  %p1500_p7 = por %p1499_p5, %p1498_p4 }
  0x1c   : > { %p1501_p8 = pnand %p1500_p7, %p1496_p3 }
  0x1e   : > { %1504 = shalt.err (!%p1501_p8)
}
  0x1f   : > { %s1505_s29 = scalar_lea.vmem %s1689_s10, 1024  ;;  %s1586_s30 = smov [#allocation2]  }
  0x20   : > { %p1506_p10 = scmp.ne.s32.totalorder %s1689_s10, %s1505_s29  ;;  %s1510_s5 = sshll.u32 %s1586_s30, 4  ;;  %s1511_s5 = int_to_ptr.vmem [resolvable:$false] %s1510_s5 }
  0x21   : > { %s1512_s6 = scalar_lea.vmem %s1511_s5, 2048  ;;  %p1513_p2 = scmp.lt.s32.totalorder %s1689_s10, %s1511_s5 }
  0x22   : > { %p1508_p9 = pnand %p1506_p10, %p1494_p1  ;;  %p1514_p12 = scmp.lt.s32.totalorder %s1512_s6, %s1505_s29 }
  0x24   : > { %p1509_p0 = pneg %p1508_p9  ;;  %p1515_p11 = por %p1514_p12, %p1513_p2 }
  0x26   : > { %p1516_p6 = pnand %p1515_p11, %p1509_p0 }
  0x28   : > { %1519 = shalt.err (!%p1516_p6)
}
  0x29   : > { %s1587_s7 = smov 256   ;;  %s1588_s9 = smov 16  }
  0x2a   : > { %1350 = dma.hbm_to_vmem [thread:$0]  (!%p1685_p13), %s1681_s8, 1024, %s1689_s10, %s1691_s12, %s1587_s7, %s1587_s7, %s1588_s9  }
  0x2b   : > { %p1218_p9 = scmp.ge.s32.totalorder %s1584_s18, 1  ;;  %p193_p1 = scmp.lt.s32.totalorder %s1584_s18, 3 }
  0x2d   : > { %p194_p3 = pnand %p1218_p9, %p193_p1 }
  0x2f   : > { %197 = sbr.rel (%p194_p3) target bundleno = 616 (0x268), region = 36 }
  0x34   : > { %s1715_s13 = sand.u32 1, %s1576_s16   ;;  %p2659_p6 = scmp.ne.s32.totalorder %s2655_s26, 0 }
  0x35   : > { %s1219_s14 = sshll.u32 %s1715_s13, 6  ;;  %s200_s20 = scalar_lea.sflag [#allocation3], %s1715_s13 }
  0x36   : > { %s1719_s22 = scalar_lea.vmem [#allocation2], %s1219_s14 }
  0x37   : > { %1563 = dma.done.wait (%p2659_p6), %s200_s20, 1024  }
  0x38   : > { %1565 = vsyncadd (%p2659_p6), %s200_s20, 4294966272  ;;  %s1221_s8 = sshll.u32 %s1639_s19, 4  ;;  %v1589_v0 = vmov 0   ;;  %v918_v17 = vld [vmem:[%s2646_s3 + $0xf8] sm:$0xff]  ;;  %v917_v19 = vld [vmem:[%s2646_s3 + $0xf0] sm:$0xff]  ;;  %v341_v40 = vlaneseq  ;;  %s1220_s30 = sshll.u32 %s1715_s13, 7 }
  0x39   : > { %1395 = vset.pattern.permute.xlu1 %v1589_v0  ;;  %1394 = vset.pattern.permute.xlu0 %v1589_v0  ;;  %p235_p11 = scmp.lt.s32.totalorder %s1221_s8, 31  ;;  %v902_v18 = vld [vmem:[%s2646_s3 + $0x78] sm:$0xff]  ;;  %v901_v20 = vld [vmem:[%s2646_s3 + $0x70] sm:$0xff]  ;;  %v916_v21 = vld [vmem:[%s2646_s3 + $0xe8] sm:$0xff]  ;;  %s2573_s5 = scalar_lea.vmem [#allocation5], %s1220_s30 }
  0x3a   : > { %1231 = vmatprep.subr.mxu0 %v918_v17  ;;  %1311 = vmatprep.subr.mxu1 %v918_v17  ;;  %v900_v22 = vld [vmem:[%s2646_s3 + $0x68] sm:$0xff]  ;;  %v915_v23 = vld [vmem:[%s2646_s3 + $0xe0] sm:$0xff]  ;;  %v914_v25 = vld [vmem:[%s2646_s3 + $0xd8] sm:$0xff]  ;;  %v342_v47 = vshrl.u32 %v341_v40, 7  ;;  %s1230_s6 = sshll.u32 %s1639_s19, 11  ;;  %s1126_s7 = sshll.u32 %s2573_s5, 4  ;;  %s2599_s7 = int_to_ptr.vmem [resolvable:$true] %s1126_s7 }
  0x3b   : > { %s2758_s8 = smov (!%p235_p11, %s1221_s8), 31  ;;  %1232 = vmatpush3.msra.mxu0 %v902_v18  ;;  %1327 = vmatpush3.msra.mxu1 %v902_v18  ;;  %v899_v24 = vld [vmem:[%s2646_s3 + $0x60] sm:$0xff]  ;;  %v898_v26 = vld [vmem:[%s2646_s3 + $0x58] sm:$0xff]  ;;  %v913_v27 = vld [vmem:[%s2646_s3 + $0xd0] sm:$0xff]  ;;  %s2597_s20 = scalar_lea.hbm %s2647_s4, %s1230_s6 }
  0x3c   : > { %s1222_s10 = sshll.u32 %s2758_s8, 3  ;;  %1233 = vmatprep.subr.mxu0 %v917_v19  ;;  %1312 = vmatprep.subr.mxu1 %v917_v19  ;;  %v897_v28 = vld [vmem:[%s2646_s3 + $0x50] sm:$0xff]  ;;  %v912_v29 = vld [vmem:[%s2646_s3 + $0xc8] sm:$0xff]  ;;  %v479_v30 = vld [vmem:[%s1719_s22] sm:$0xff]  ;;  %v343_v56 = vsub.s32 0, %v342_v47  ;;  %v347_v62 = vsub.s32 1, %v342_v47 }
  0x3d   : > { %s238_s23 = scalar_lea.vmem %s2644_s1, %s1222_s10  ;;  %1234 = vmatpush3.msra.mxu0 %v901_v20  ;;  %1328 = vmatpush3.msra.mxu1 %v901_v20  ;;  %v480_v31 = vld [vmem:[%s1719_s22 + $0x8] sm:$0xff]  ;;  %vm487_vm0 = vnez %v479_v30  ;;  %v483_v32 = vld [vmem:[%s1719_s22 + $0x20] sm:$0xff]  ;;  %v481_v55 = vld [vmem:[%s1719_s22 + $0x10] sm:$0xff]  ;;  %s1113_s19 = scalar_lea.sflag [#allocation4], %s1715_s13 }
  0x3e   : > { %v244_v1 = vld [vmem:[%s238_s23 + $0x8] sm:$0xff]  ;;  %v243_v2 = vld [vmem:[%s238_s23] sm:$0xff]  ;;  %v253_v5 = vld [vmem:[%s238_s23 + $0x50] sm:$0xff]  ;;  %1235 = vmatprep.subr.mxu0 %v916_v21  ;;  %1313 = vmatprep.subr.mxu1 %v916_v21  ;;  %vm488_vm1 = vnez %v480_v31  ;;  %v1775_v34 = vsel %vm487_vm0, 16843009, %v1589_v0  ;;  %vm491_vm2 = vnez %v483_v32  ;;  %vm489_vm6 = vnez %v481_v55  ;;  %s1520_s8 = scalar_lea.vmem %s2599_s7, 2048 }
  0x3f   : > { %267 = vperm.xlu1 %1395, %v244_v1   ;;  %262 = vperm.xlu0 %1394, %v243_v2   ;;  %v252_v3 = vld [vmem:[%s238_s23 + $0x48] sm:$0xff]  ;;  %v251_v4 = vld [vmem:[%s238_s23 + $0x40] sm:$0xff]  ;;  %v245_v6 = vld [vmem:[%s238_s23 + $0x10] sm:$0xff]  ;;  %v1778_v35 = vsel %vm488_vm1, 16843009, %v1589_v0  ;;  %v503_v36 = vunpack.c.0.s8 %v1775_v34  ;;  %v505_v38 = vunpack.c.1.s8 %v1775_v34  ;;  %v507_v52 = vunpack.c.2.s8 %v1775_v34  ;;  %p1521_p12 = scmp.ne.s32.totalorder %s2599_s7, %s1520_s8  ;;  %p2750_p13 = scmp.ne.s32.totalorder %s2656_s27, 0 }
  0x40   : > { %v254_v7 = vld [vmem:[%s238_s23 + $0x58] sm:$0xff]  ;;  %v255_v9 = vld [vmem:[%s238_s23 + $0x60] sm:$0xff]  ;;  %v256_v11 = vld [vmem:[%s238_s23 + $0x68] sm:$0xff]  ;;  %1236 = vmatpush3.msra.mxu0 %v900_v22  ;;  %1329 = vmatpush3.msra.mxu1 %v900_v22  ;;  %v504_v37 = vunpack.c.0.s8 %v1778_v35  ;;  %v506_v39 = vunpack.c.1.s8 %v1778_v35  ;;  %v499_v41 = vsel %vm491_vm2, 16843009, %v1589_v0  ;;  %v508_v53 = vunpack.c.2.s8 %v1778_v35  ;;  %s1590_s10 = smov [#allocation5]  }
  0x41   : > { %v246_v8 = vld [vmem:[%s238_s23 + $0x18] sm:$0xff]  ;;  %v247_v10 = vld [vmem:[%s238_s23 + $0x20] sm:$0xff]  ;;  %v248_v12 = vld [vmem:[%s238_s23 + $0x28] sm:$0xff]  ;;  %1237 = vmatprep.subr.mxu0 %v915_v23  ;;  %1314 = vmatprep.subr.mxu1 %v915_v23  ;;  %v519_v45 = vunpack.c.0.s8 %v499_v41  ;;  %v521_v48 = vunpack.c.1.s8 %v499_v41  ;;  %v523_v63 = vunpack.c.2.s8 %v499_v41  ;;  %p1522_p4 = pnand %p1521_p12, %p2750_p13  ;;  %s1524_s11 = sshll.u32 %s1590_s10, 4  ;;  %s1525_s11 = int_to_ptr.vmem [resolvable:$false] %s1524_s11 }
  0x42   : > { %v257_v13 = vld [vmem:[%s238_s23 + $0x70] sm:$0xff]  ;;  %v258_v15 = vld [vmem:[%s238_s23 + $0x78] sm:$0xff]  ;;  %1238 = vmatpush3.msra.mxu0 %v899_v24  ;;  %1330 = vmatpush3.msra.mxu1 %v899_v24  ;;  %v484_v33 = vld [vmem:[%s1719_s22 + $0x28] sm:$0xff]  ;;  %v535_v43 = vpack.c.b16 %v504_v37, %v503_v36  ;;  %v537_v44 = vpack.c.b16 %v506_v39, %v505_v38  ;;  %v539_v2 = vpack.c.b16 %v508_v53, %v507_v52  ;;  %p1527_p7 = scmp.lt.s32.totalorder %s2599_s7, %s1525_s11 }
  0x43   : > { %307 = vperm.xlu1 %1395, %v252_v3   ;;  %302 = vperm.xlu0 %1394, %v251_v4   ;;  %v249_v14 = vld [vmem:[%s238_s23 + $0x30] sm:$0xff]  ;;  %v250_v16 = vld [vmem:[%s238_s23 + $0x38] sm:$0xff]  ;;  %vm492_vm3 = vnez %v484_v33  ;;  %v259_v61 = vld [vmem:[%s2645_s2] sm:$0x3]  ;;  %p1523_p5 = pneg %p1522_p4 }
  0x44   : > { %1239 = vmatprep.subr.mxu0 %v914_v25  ;;  %1315 = vmatprep.subr.mxu1 %v914_v25  ;;  %v500_v42 = vsel %vm492_vm3, 16843009, %v1589_v0  ;;  %v536_v50 = vpack.c.b8 %v535_v43, %v535_v43  ;;  %v538_v51 = vpack.c.b8 %v537_v44, %v537_v44  ;;  %v482_v58 = vld [vmem:[%s1719_s22 + $0x18] sm:$0xff]  ;;  %v485_v59 = vld [vmem:[%s1719_s22 + $0x30] sm:$0xff]  ;;  %v1795_v4 = vrot.slane %v259_v61, %v343_v56 }
  0x45   : > { %1240 = vmatpush3.msra.mxu0 %v898_v26  ;;  %1331 = vmatpush3.msra.mxu1 %v898_v26  ;;  %v520_v46 = vunpack.c.0.s8 %v500_v42  ;;  %v522_v49 = vunpack.c.1.s8 %v500_v42  ;;  %v486_v60 = vld [vmem:[%s1719_s22 + $0x38] sm:$0xff]  ;;  %v524_v1 = vunpack.c.2.s8 %v500_v42  ;;  %vm490_vm7 = vnez %v482_v58  ;;  %s1526_s22 = scalar_lea.vmem %s1525_s11, 4096 }
  0x46   : > { %1241 = vmatprep.subr.mxu0 %v913_v27  ;;  %1316 = vmatprep.subr.mxu1 %v913_v27  ;;  %vm567_vm4 = vnez %v536_v50  ;;  %vm568_vm5 = vnez %v538_v51  ;;  %vm493_vm8 = vnez %v485_v59  ;;  %vm494_vm9 = vnez %v486_v60  ;;  %p1528_p8 = scmp.lt.s32.totalorder %s1526_s22, %s1520_s8 }
  0x47   : > { %312 = vperm.xlu1 %1395, %v253_v5   ;;  %272 = vperm.xlu0 %1394, %v245_v6   ;;  %v551_v54 = vpack.c.b16 %v520_v46, %v519_v45  ;;  %v553_v57 = vpack.c.b16 %v522_v49, %v521_v48  ;;  %v509_v6 = vunpack.c.3.s8 %v1775_v34  ;;  %v540_v18 = vpack.c.b8 %v539_v2, %v539_v2 }
  0x48   : > { %1242 = vmatpush3.msra.mxu0 %v897_v28  ;;  %1332 = vmatpush3.msra.mxu1 %v897_v28  ;;  %v555_v19 = vpack.c.b16 %v524_v1, %v523_v63  ;;  %p1529_p10 = por %p1528_p8, %p1527_p7 }
  0x49   : > { %1243 = vmatprep.subr.mxu0 %v912_v29  ;;  %1317 = vmatprep.subr.mxu1 %v912_v29  ;;  %v552_v3 = vpack.c.b8 %v551_v54, %v551_v54  ;;  %v554_v5 = vpack.c.b8 %v553_v57, %v553_v57  ;;  %vm569_vm12 = vnez %v540_v18 }
  0x4a   : > { %v556_v38 = vpack.c.b8 %v555_v19, %v555_v19  ;;  %v1835_v52 = vsel %vm569_vm12, 16843009, %v1589_v0  ;;  %p1530_p0 = pnand %p1529_p10, %p1523_p5 }
  0x4b   : > { %317 = vperm.xlu1 %1395, %v254_v7   ;;  %277 = vperm.xlu0 %1394, %v246_v8   ;;  %v510_v7 = vunpack.c.3.s8 %v1778_v35  ;;  %v1800_v8 = vsel %vm567_vm4, 16843009, %v1589_v0  ;;  %vm1811_vm10 = vnez %v552_v3  ;;  %vm1818_vm11 = vnez %v554_v5 }
  0x4c   : > { %v599_v20 = vunpack.c.0.s8 %v1800_v8  ;;  %v600_v21 = vunpack.c.1.s8 %v1800_v8  ;;  %v1826_v37 = vsel %vm1811_vm10, 16843009, %v1589_v0  ;;  %v1831_v47 = vsel %vm1818_vm11, 16843009, %v1589_v0 }
  0x4d   : > { %v541_v28 = vpack.c.b16 %v510_v7, %v509_v6  ;;  %v615_v51 = vunpack.c.0.s8 %v1826_v37  ;;  %vm577_vm13 = vnez %v556_v38  ;;  %v616_v58 = vunpack.c.1.s8 %v1826_v37 }
  0x4e   : > { %v618_v1 = vunpack.c.1.s8 %v1831_v47  ;;  %v603_v2 = vunpack.c.0.s8 %v1835_v52  ;;  %v1842_v3 = vsel %vm577_vm13, 16843009, %v1589_v0 }
  0x4f   : > { %322 = vperm.xlu1 %1395, %v255_v9   ;;  %282 = vperm.xlu0 %1394, %v247_v10   ;;  %v1803_v9 = vsel %vm568_vm5, 16843009, %v1589_v0  ;;  %v525_v10 = vunpack.c.3.s8 %v499_v41  ;;  %v542_v43 = vpack.c.b8 %v541_v28, %v541_v28  ;;  %vm1929_vm12 = vcmp.ne.s32.totalorder %v615_v51, 0 }
  0x50   : > { %v601_v22 = vunpack.c.0.s8 %v1803_v9  ;;  %v602_v36 = vunpack.c.1.s8 %v1803_v9 }
  0x51   : > { %vm570_vm14 = vnez %v542_v43 }
  0x52   : > { %v1845_v6 = vsel %vm570_vm14, 16843009, %v1589_v0  ;;  %vm1900_vm10 = vcmp.ne.s32.totalorder %v602_v36, 0 }
  0x53   : > { %327 = vperm.xlu1 %1395, %v256_v11   ;;  %287 = vperm.xlu0 %1394, %v248_v12   ;;  %v497_v11 = vsel %vm489_vm6, 16843009, %v1589_v0  ;;  %v526_v12 = vunpack.c.3.s8 %v500_v42  ;;  %v606_v23 = vunpack.c.1.s8 %v1845_v6  ;;  %vm1867_vm6 = vcmp.ne.s32.totalorder %v599_v20, 0 }
  0x54   : > { %v511_v24 = vunpack.c.0.s8 %v497_v11  ;;  %v513_v30 = vunpack.c.1.s8 %v497_v11  ;;  %v515_v34 = vunpack.c.2.s8 %v497_v11  ;;  %v517_v45 = vunpack.c.3.s8 %v497_v11 }
  0x55   : > { %v557_v29 = vpack.c.b16 %v526_v12, %v525_v10  ;;  %v604_v10 = vunpack.c.1.s8 %v1835_v52 }
  0x57   : > { %332 = vperm.xlu1 %1395, %v257_v13   ;;  %292 = vperm.xlu0 %1394, %v249_v14   ;;  %v498_v13 = vsel %vm490_vm7, 16843009, %v1589_v0  ;;  %v501_v14 = vsel %vm493_vm8, 16843009, %v1589_v0  ;;  %v558_v48 = vpack.c.b8 %v557_v29, %v557_v29  ;;  %vm1873_vm7 = vcmp.ne.s32.totalorder %v600_v21, 0 }
  0x58   : > { %v512_v25 = vunpack.c.0.s8 %v498_v13  ;;  %v527_v26 = vunpack.c.0.s8 %v501_v14  ;;  %v514_v31 = vunpack.c.1.s8 %v498_v13  ;;  %v529_v32 = vunpack.c.1.s8 %v501_v14 }
  0x59   : > { %v516_v35 = vunpack.c.2.s8 %v498_v13  ;;  %v531_v41 = vunpack.c.2.s8 %v501_v14  ;;  %v518_v46 = vunpack.c.3.s8 %v498_v13  ;;  %v533_v53 = vunpack.c.3.s8 %v501_v14 }
  0x5a   : > { %v543_v39 = vpack.c.b16 %v512_v25, %v511_v24  ;;  %v545_v44 = vpack.c.b16 %v514_v31, %v513_v30  ;;  %vm578_vm15 = vnez %v558_v48  ;;  %v619_v13 = vunpack.c.0.s8 %v1842_v3 }
  0x5b   : > { %337 = vperm.xlu1 %1395, %v258_v15   ;;  %297 = vperm.xlu0 %1394, %v250_v16   ;;  %v502_v15 = vsel %vm494_vm9, 16843009, %v1589_v0  ;;  %v1809_v16 = vrot.slane %v259_v61, %v347_v62  ;;  %v547_v50 = vpack.c.b16 %v516_v35, %v515_v34  ;;  %v549_v60 = vpack.c.b16 %v518_v46, %v517_v45 }
  0x5c   : > { %v528_v27 = vunpack.c.0.s8 %v502_v15  ;;  %v530_v33 = vunpack.c.1.s8 %v502_v15  ;;  %v532_v42 = vunpack.c.2.s8 %v502_v15  ;;  %v534_v54 = vunpack.c.3.s8 %v502_v15 }
  0x5d   : > { %v544_v55 = vpack.c.b8 %v543_v39, %v543_v39  ;;  %v546_v59 = vpack.c.b8 %v545_v44, %v545_v44  ;;  %v617_v61 = vunpack.c.0.s8 %v1831_v47  ;;  %v548_v63 = vpack.c.b8 %v547_v50, %v547_v50 }
  0x5e   : > { %v559_v40 = vpack.c.b16 %v528_v27, %v527_v26  ;;  %v561_v49 = vpack.c.b16 %v530_v33, %v529_v32  ;;  %v563_v57 = vpack.c.b16 %v532_v42, %v531_v41  ;;  %v565_v5 = vpack.c.b16 %v534_v54, %v533_v53 }
  0x5f   : > { %vm571_vm0 = vnez %v544_v55  ;;  %v1849_v11 = vsel %vm578_vm15, 16843009, %v1589_v0  ;;  %vm572_vm2 = vnez %v546_v59  ;;  %v550_v12 = vpack.c.b8 %v549_v60, %v549_v60 }
  0x60   : > { %v560_v56 = vpack.c.b8 %v559_v40, %v559_v40  ;;  %v562_v62 = vpack.c.b8 %v561_v49, %v561_v49  ;;  %v564_v7 = vpack.c.b8 %v563_v57, %v563_v57  ;;  %v620_v14 = vunpack.c.1.s8 %v1842_v3 }
  0x61   : > { %vm573_vm4 = vnez %v548_v63  ;;  %v605_v15 = vunpack.c.0.s8 %v1845_v6  ;;  %v1855_v17 = vsel %vm571_vm0, 16843009, %v1589_v0  ;;  %v566_v19 = vpack.c.b8 %v565_v5, %v565_v5 }
  0x62   : > { %vm579_vm1 = vnez %v560_v56  ;;  %vm580_vm3 = vnez %v562_v62  ;;  %v621_v24 = vunpack.c.0.s8 %v1849_v11  ;;  %v1863_v25 = vsel %vm572_vm2, 16843009, %v1589_v0 }
  0x63   : > { %v1858_v18 = vsel %vm579_vm1, 16843009, %v1589_v0  ;;  %vm581_vm5 = vnez %v564_v7  ;;  %v622_v28 = vunpack.c.1.s8 %v1849_v11  ;;  %v1879_v29 = vsel %vm580_vm3, 16843009, %v1589_v0 }
  0x64   : > { %v1882_v30 = vsel %vm573_vm4, 16843009, %v1589_v0  ;;  %vm1884_vm8 = vnez %v550_v12  ;;  %v607_v20 = vunpack.c.0.s8 %v1855_v17  ;;  %v608_v8 = vunpack.c.1.s8 %v1855_v17 }
  0x65   : > { %v623_v21 = vunpack.c.0.s8 %v1858_v18  ;;  %v624_v32 = vunpack.c.1.s8 %v1858_v18  ;;  %vm1894_vm9 = vcmp.ne.s32.totalorder %v601_v22, 0  ;;  %v1907_v39 = vsel %vm581_vm5, 16843009, %v1589_v0 }
  0x66   : > { %vm582_vm11 = vnez %v566_v19  ;;  %v1915_v36 = vsel %vm1884_vm8, 16843009, %v1589_v0  ;;  %vm1940_vm0 = vcmp.ne.s32.totalorder %v616_v58, 0  ;;  %vm1946_vm1 = vcmp.ne.s32.totalorder %v617_v61, 0 }
  0x67   : > { %v1925_v53 = vsel %vm582_vm11, 16843009, %v1589_v0  ;;  %vm1952_vm3 = vcmp.ne.s32.totalorder %v618_v1, 0  ;;  %vm1985_vm5 = vcmp.ne.s32.totalorder %v603_v2, 0  ;;  %vm2027_vm11 = vcmp.ne.s32.totalorder %v620_v14, 0 }
  0x68   : > { %v2719_v35 = vunpack.c.1.s8 %v1879_v29 }
  0xba   : > { %v268_v40 = vpop.permute.xlu1 %267  ;;  %v263_v41 = vpop.permute.xlu0 %262 }
  0xbb   : > { %v353_v43 = vadd.f32 %v1795_v4, %v268_v40  ;;  %v354_v44 = vadd.f32 %v1809_v16, %v268_v40  ;;  %v351_v45 = vadd.f32 %v1795_v4, %v263_v41  ;;  %v352_v46 = vadd.f32 %v1809_v16, %v263_v41 }
  0xbd   : > { %v417_v54 = vmul.f32 0.2, %v353_v43  ;;  %v418_v55 = vmul.f32 0.2, %v354_v44  ;;  %v415_v56 = vmul.f32 0.2, %v351_v45 }
  0xbe   : > { %v416_v60 = vmul.f32 0.2, %v352_v46  ;;  %v308_v62 = vpop.permute.xlu1 %307  ;;  %v303_v63 = vpop.permute.xlu0 %302  ;;  %vm383_vm13 = vcmp.gt.f32.partialorder %v351_v45, 0.0  ;;  %vm384_vm14 = vcmp.gt.f32.partialorder %v352_v46, 0.0  ;;  %vm385_vm15 = vcmp.gt.f32.partialorder %v353_v43, 0.0 }
  0xbf   : > { %v369_v0 = vadd.f32 %v1795_v4, %v308_v62  ;;  %v370_v5 = vadd.f32 %v1809_v16, %v308_v62  ;;  %v367_v7 = vadd.f32 %v1795_v4, %v303_v63  ;;  %v368_v12 = vadd.f32 %v1809_v16, %v303_v63 }
  0xc0   : > { %v447_v31 = vsel %vm383_vm13, %v351_v45, %v415_v56  ;;  %v448_v40 = vsel %vm384_vm14, %v352_v46, %v416_v60  ;;  %vm386_vm2 = vcmp.gt.f32.partialorder %v354_v44, 0.0  ;;  %v449_v41 = vsel %vm385_vm15, %v353_v43, %v417_v54 }
  0xc1   : > { %v433_v62 = vmul.f32 0.2, %v369_v0  ;;  %v434_v59 = vmul.f32 0.2, %v370_v5  ;;  %v431_v50 = vmul.f32 0.2, %v367_v7  ;;  %v450_v63 = vsel %vm386_vm2, %v354_v44, %v418_v55 }
  0xc2   : > { %v432_v58 = vmul.f32 0.2, %v368_v12  ;;  %v313_v49 = vpop.permute.xlu1 %312  ;;  %v273_v61 = vpop.permute.xlu0 %272  ;;  %v1958_v48 = vsel %vm1867_vm6, %v447_v31, -9e+15  ;;  %v1962_v43 = vsel %vm1873_vm7, %v448_v40, -9e+15 }
  0xc3   : > { %v1966_v44 = vadd.f32 %v1795_v4, %v313_v49  ;;  %v1969_v47 = vadd.f32 %v1809_v16, %v313_v49  ;;  %v355_v1 = vadd.f32 %v1795_v4, %v273_v61  ;;  %v356_v46 = vadd.f32 %v1809_v16, %v273_v61 }
  0xc4   : > { %v695_v26 = vmax.f32 %v1958_v48, %v1962_v43  ;;  %v1977_v27 = vsel %vm1894_vm9, %v449_v41, -9e+15  ;;  %v1981_v54 = vsel %vm1900_vm10, %v450_v63, -9e+15  ;;  %vm399_vm4 = vcmp.gt.f32.partialorder %v367_v7, 0.0 }
  0xc5   : > { %vm1991_vm6 = vcmp.ne.s32.totalorder %v604_v10, 0  ;;  %v1996_v33 = vmul.f32 0.2, %v1966_v44  ;;  %v1999_v34 = vmul.f32 0.2, %v1969_v47  ;;  %v698_v60 = vmax.f32 %v1977_v27, %v1981_v54 }
  0xc6   : > { %v419_v56 = vmul.f32 0.2, %v355_v1  ;;  %v420_v2 = vmul.f32 0.2, %v356_v46  ;;  %696 = vmax.xlane.f32.xlu0 %v695_v26  ;;  %v318_v31 = vpop.permute.xlu1 %317  ;;  %v278_v40 = vpop.permute.xlu0 %277  ;;  %vm400_vm7 = vcmp.gt.f32.partialorder %v368_v12, 0.0  ;;  %v463_v52 = vsel %vm399_vm4, %v367_v7, %v431_v50 }
  0xc7   : > { %vm401_vm8 = vcmp.gt.f32.partialorder %v369_v0, 0.0  ;;  %v2004_v10 = vadd.f32 %v1795_v4, %v318_v31  ;;  %v2007_v41 = vadd.f32 %v1809_v16, %v318_v31  ;;  %v2010_v63 = vadd.f32 %v1795_v4, %v278_v40 }
  0xc8   : > { %v2013_v61 = vadd.f32 %v1809_v16, %v278_v40  ;;  %vm2017_vm9 = vcmp.ne.s32.totalorder %v619_v13, 0  ;;  %v464_v50 = vsel %vm400_vm7, %v368_v12, %v432_v58  ;;  %v2023_v7 = vsel %vm1929_vm12, %v463_v52, -9e+15 }
  0xc9   : > { %vm402_vm10 = vcmp.gt.f32.partialorder %v370_v5, 0.0  ;;  %v465_v31 = vsel %vm401_vm8, %v369_v0, %v433_v62  ;;  %v2032_v40 = vmul.f32 0.2, %v2004_v10  ;;  %v2035_v13 = vmul.f32 0.2, %v2007_v41 }
  0xca   : > { %v421_v12 = vmul.f32 0.2, %v2010_v63  ;;  %v466_v58 = vsel %vm402_vm10, %v370_v5, %v434_v59  ;;  %v422_v57 = vmul.f32 0.2, %v2013_v61  ;;  %699 = vmax.xlane.f32.xlu0 %v698_v60  ;;  %v2041_v0 = vsel %vm1940_vm0, %v464_v50, -9e+15  ;;  %v323_v3 = vpop.permute.xlu1 %322  ;;  %v283_v14 = vpop.permute.xlu0 %282 }
  0xcb   : > { %v2045_v62 = vsel %vm1946_vm1, %v465_v31, -9e+15  ;;  %vm2049_vm12 = vcmp.ne.s32.totalorder %v605_v15, 0  ;;  %vm2055_vm13 = vcmp.ne.s32.totalorder %v606_v23, 0  ;;  %v719_v51 = vmax.f32 %v2023_v7, %v2041_v0 }
  0xcc   : > { %v2063_v19 = vadd.f32 %v1795_v4, %v323_v3  ;;  %v2066_v60 = vadd.f32 %v1809_v16, %v323_v3  ;;  %v2069_v15 = vadd.f32 %v1795_v4, %v283_v14  ;;  %v2072_v6 = vadd.f32 %v1809_v16, %v283_v14 }
  0xcd   : > { %v2076_v23 = vsel %vm1952_vm3, %v466_v58, -9e+15  ;;  %vm387_vm14 = vcmp.gt.f32.partialorder %v355_v1, 0.0  ;;  %vm388_vm15 = vcmp.gt.f32.partialorder %v356_v46, 0.0  ;;  %720 = vmax.xlane.f32.xlu1 %v719_v51  ;;  %vm2091_vm0 = vcmp.ne.s32.totalorder %v621_v24, 0 }
  0xce   : > { %v2079_v50 = vmul.f32 0.2, %v2063_v19  ;;  %v2082_v31 = vmul.f32 0.2, %v2066_v60  ;;  %v2085_v3 = vmul.f32 0.2, %v2069_v15  ;;  %v722_v14 = vmax.f32 %v2045_v62, %v2076_v23  ;;  %v328_v9 = vpop.permute.xlu1 %327  ;;  %v288_v42 = vpop.permute.xlu0 %287 }
  0xcf   : > { %v2096_v58 = vmul.f32 0.2, %v2072_v6  ;;  %v451_v51 = vsel %vm387_vm14, %v355_v1, %v419_v56  ;;  %v452_v5 = vsel %vm388_vm15, %v356_v46, %v420_v2  ;;  %vm403_vm1 = vcmp.gt.f32.partialorder %v1966_v44, 0.0 }
  0xd0   : > { %vm2101_vm2 = vcmp.ne.s32.totalorder %v622_v28, 0  ;;  %723 = vmax.xlane.f32.xlu0 %v722_v14  ;;  %v2107_v24 = vsel %vm1985_vm5, %v451_v51, -9e+15  ;;  %v2111_v38 = vsel %vm1991_vm6, %v452_v5, -9e+15  ;;  %v2114_v1 = vadd.f32 %v1795_v4, %v328_v9 }
  0xd1   : > { %v2117_v46 = vadd.f32 %v1809_v16, %v328_v9  ;;  %vm2121_vm3 = vcmp.ne.s32.totalorder %v607_v20, 0  ;;  %vm2127_vm4 = vcmp.ne.s32.totalorder %v608_v8, 0  ;;  %v701_v49 = vmax.f32 %v2107_v24, %v2111_v38 }
  0xd2   : > { %v2134_v55 = vadd.f32 %v1795_v4, %v288_v42  ;;  %v2137_v9 = vadd.f32 %v1809_v16, %v288_v42  ;;  %vm404_vm5 = vcmp.gt.f32.partialorder %v1969_v47, 0.0  ;;  %v2141_v20 = vmul.f32 0.2, %v2114_v1  ;;  %v333_v14 = vpop.permute.xlu1 %332  ;;  %v293_v51 = vpop.permute.xlu0 %292 }
  0xd3   : > { %v2144_v17 = vmul.f32 0.2, %v2117_v46  ;;  %v467_v8 = vsel %vm403_vm1, %v1966_v44, %v1996_v33  ;;  %v468_v56 = vsel %vm404_vm5, %v1969_v47, %v1999_v34  ;;  %702 = vmax.xlane.f32.xlu1 %v701_v49  ;;  %vm389_vm6 = vcmp.gt.f32.partialorder %v2010_v63, 0.0 }
  0xd4   : > { %v2151_v2 = vmul.f32 0.2, %v2134_v55  ;;  %v2154_v42 = vmul.f32 0.2, %v2137_v9  ;;  %v2158_v5 = vsel %vm2017_vm9, %v467_v8, -9e+15  ;;  %v2168_v47 = vadd.f32 %v1795_v4, %v333_v14 }
  0xd5   : > { %2702 = vst [vmem:[#allocation8_spill] sm:$0xff] %v2158_v5  ;;  %v2163_v44 = vsel %vm2027_vm11, %v468_v56, -9e+15  ;;  %vm390_vm7 = vcmp.gt.f32.partialorder %v2013_v61, 0.0  ;;  %vm2172_vm8 = vcmp.ne.s32.totalorder %v623_v21, 0  ;;  %vm2178_vm9 = vcmp.ne.s32.totalorder %v624_v32, 0 }
  0xd6   : > { %2703 = vst [vmem:[#allocation9_spill] sm:$0xff] %v2163_v44  ;;  %v725_v45 = vmax.f32 %v2158_v5, %v2163_v44  ;;  %v453_v26 = vsel %vm389_vm6, %v2010_v63, %v421_v12  ;;  %v454_v49 = vsel %vm390_vm7, %v2013_v61, %v422_v57  ;;  %v2187_v8 = vadd.f32 %v1809_v16, %v333_v14  ;;  %v891_v57 = vld [vmem:[%s2646_s3 + $0x20] sm:$0xff] }
  0xd7   : > { %v2708_v21 = vunpack.c.0.s8 %v1863_v25  ;;  %v2197_v18 = vsel %vm2049_vm12, %v453_v26, -9e+15  ;;  %v2201_v32 = vsel %vm2055_vm13, %v454_v49, -9e+15  ;;  %v2204_v63 = vmul.f32 0.2, %v2168_v47  ;;  %v338_v26 = vpop.permute.xlu1 %337 }
  0xd8   : > { %2711 = vst [vmem:[#allocation10_spill] sm:$0xff] %v2197_v18  ;;  %2712 = vst [vmem:[#allocation11_spill] sm:$0xff] %v2201_v32  ;;  %v2207_v61 = vadd.f32 %v1795_v4, %v293_v51  ;;  %v2713_v12 = vunpack.c.1.s8 %v1863_v25  ;;  %726 = vmax.xlane.f32.xlu0 %v725_v45  ;;  %v704_v52 = vmax.f32 %v2197_v18, %v2201_v32  ;;  %v2218_v59 = vmul.f32 0.2, %v2187_v8  ;;  %v896_v45 = vld [vmem:[%s2646_s3 + $0x48] sm:$0xff]  ;;  %v910_v18 = vld [vmem:[%s2646_s3 + $0xb8] sm:$0xff] }
  0xd9   : > { %vm2191_vm10 = vcmp.ne.s32.totalorder %v2708_v21, 0  ;;  %v2221_v14 = vadd.f32 %v1809_v16, %v293_v51  ;;  %vm405_vm12 = vcmp.gt.f32.partialorder %v2004_v10, 0.0  ;;  %v2716_v49 = vunpack.c.0.s8 %v1879_v29  ;;  %v911_v21 = vld [vmem:[%s2646_s3 + $0xc0] sm:$0xff]  ;;  %1244 = vmatpush3.msra.mxu0 %v896_v45  ;;  %1333 = vmatpush3.msra.mxu1 %v896_v45 }
  0xda   : > { %vm2211_vm11 = vcmp.ne.s32.totalorder %v2713_v12, 0  ;;  %v895_v51 = vld [vmem:[%s2646_s3 + $0x40] sm:$0xff]  ;;  %v2240_v12 = vmul.f32 0.2, %v2207_v61  ;;  %vm406_vm14 = vcmp.gt.f32.partialorder %v2007_v41, 0.0  ;;  %vm391_vm15 = vcmp.gt.f32.partialorder %v2069_v15, 0.0  ;;  %705 = vmax.xlane.f32.xlu1 %v704_v52  ;;  %1245 = vmatprep.subr.mxu0 %v911_v21 }
  0xdb   : > { %vm2226_vm13 = vcmp.ne.s32.totalorder %v2716_v49, 0  ;;  %v469_v49 = vsel %vm405_vm12, %v2004_v10, %v2032_v40  ;;  %vm2248_vm1 = vcmp.ne.s32.totalorder %v2719_v35, 0  ;;  %v2256_v44 = vmul.f32 0.2, %v2221_v14  ;;  %v298_v35 = vpop.permute.xlu0 %297  ;;  %1246 = vmatpush3.msra.mxu0 %v895_v51  ;;  %1318 = vmatprep.subr.mxu1 %v911_v21 }
  0xdc   : > { %v470_v10 = vsel %vm406_vm14, %v2007_v41, %v2035_v13  ;;  %v2262_v29 = vsel %vm2091_vm0, %v469_v49, -9e+15  ;;  %vm392_vm5 = vcmp.gt.f32.partialorder %v2072_v6, 0.0  ;;  %v2722_v40 = vunpack.c.0.s8 %v1882_v30  ;;  %1247 = vmatprep.subr.mxu0 %v910_v18  ;;  %1334 = vmatpush3.msra.mxu1 %v895_v51 }
  0xdd   : > { %v2725_v52 = vunpack.c.1.s8 %v1882_v30  ;;  %v2279_v41 = vsel %vm2101_vm2, %v470_v10, -9e+15  ;;  %v455_v13 = vsel %vm391_vm15, %v2069_v15, %v2085_v3  ;;  %v456_v37 = vsel %vm392_vm5, %v2072_v6, %v2096_v58  ;;  %1319 = vmatprep.subr.mxu1 %v910_v18  ;;  %v894_v18 = vld [vmem:[%s2646_s3 + $0x38] sm:$0xff] }
  0xde   : > { %vm2267_vm6 = vcmp.ne.s32.totalorder %v2722_v40, 0  ;;  %v2286_v49 = vadd.f32 %v1795_v4, %v338_v26  ;;  %v728_v30 = vmax.f32 %v2262_v29, %v2279_v41  ;;  %v2292_v40 = vsel %vm2121_vm3, %v455_v13, -9e+15  ;;  %1248 = vmatpush3.msra.mxu0 %v894_v18  ;;  %1335 = vmatpush3.msra.mxu1 %v894_v18 }
  0xdf   : > { %vm2273_vm7 = vcmp.ne.s32.totalorder %v2725_v52, 0  ;;  %v2296_v22 = vsel %vm2127_vm4, %v456_v37, -9e+15  ;;  %v2299_v15 = vadd.f32 %v1809_v16, %v338_v26  ;;  %v2728_v6 = vunpack.c.0.s8 %v1907_v39  ;;  %v905_v52 = vld [vmem:[%s2646_s3 + $0x90] sm:$0xff] }
  0xe0   : > { %v2731_v58 = vunpack.c.1.s8 %v1907_v39  ;;  %v707_v11 = vmax.f32 %v2292_v40, %v2296_v22  ;;  %v2316_v28 = vmul.f32 0.2, %v2286_v49  ;;  %v2319_v26 = vadd.f32 %v1795_v4, %v298_v35  ;;  %729 = vmax.xlane.f32.xlu0 %v728_v30 }
  0xe1   : > { %vm2303_vm0 = vcmp.ne.s32.totalorder %v2728_v6, 0  ;;  %v2322_v10 = vadd.f32 %v1809_v16, %v298_v35  ;;  %v2734_v39 = vunpack.c.0.s8 %v1915_v36  ;;  %v2331_v51 = vmul.f32 0.2, %v2299_v15 }
  0xe2   : > { %vm2309_vm2 = vcmp.ne.s32.totalorder %v2731_v58, 0  ;;  %vm407_vm4 = vcmp.gt.f32.partialorder %v2063_v19, 0.0  ;;  %vm408_vm12 = vcmp.gt.f32.partialorder %v2066_v60, 0.0  ;;  %vm393_vm14 = vcmp.gt.f32.partialorder %v2134_v55, 0.0  ;;  %708 = vmax.xlane.f32.xlu1 %v707_v11  ;;  %v909_v58 = vld [vmem:[%s2646_s3 + $0xb0] sm:$0xff] }
  0xe3   : > { %vm2326_vm3 = vcmp.ne.s32.totalorder %v2734_v39, 0  ;;  %v2737_v4 = vunpack.c.1.s8 %v1915_v36  ;;  %v429_v35 = vmul.f32 0.2, %v2319_v26  ;;  %v430_v13 = vmul.f32 0.2, %v2322_v10  ;;  %v893_v11 = vld [vmem:[%s2646_s3 + $0x30] sm:$0xff]  ;;  %1249 = vmatprep.subr.mxu0 %v909_v58  ;;  %1320 = vmatprep.subr.mxu1 %v909_v58 }
  0xe4   : > { %v471_v37 = vsel %vm407_vm4, %v2063_v19, %v2079_v50  ;;  %v472_v30 = vsel %vm408_vm12, %v2066_v60, %v2082_v31  ;;  %v2740_v36 = vunpack.c.0.s8 %v1925_v53  ;;  %vm394_vm4 = vcmp.gt.f32.partialorder %v2137_v9, 0.0  ;;  %v908_v31 = vld [vmem:[%s2646_s3 + $0xa8] sm:$0xff]  ;;  %1250 = vmatpush3.msra.mxu0 %v893_v11  ;;  %1336 = vmatpush3.msra.mxu1 %v893_v11 }
  0xe5   : > { %vm2338_vm15 = vcmp.ne.s32.totalorder %v2737_v4, 0  ;;  %v2365_v19 = vsel %vm2172_vm8, %v471_v37, -9e+15  ;;  %v2369_v60 = vsel %vm2178_vm9, %v472_v30, -9e+15  ;;  %v457_v50 = vsel %vm393_vm14, %v2134_v55, %v2151_v2  ;;  %1251 = vmatprep.subr.mxu0 %v908_v31  ;;  %1321 = vmatprep.subr.mxu1 %v908_v31  ;;  %v906_v4 = vld [vmem:[%s2646_s3 + $0x98] sm:$0xff] }
  0xe6   : > { %vm2353_vm5 = vcmp.ne.s32.totalorder %v2740_v36, 0  ;;  %v731_v33 = vmax.f32 %v2365_v19, %v2369_v60  ;;  %v458_v39 = vsel %vm394_vm4, %v2137_v9, %v2154_v42  ;;  %v2383_v34 = vsel %vm2191_vm10, %v457_v50, -9e+15  ;;  %v903_v30 = vld [vmem:[%s2646_s3 + $0x80] sm:$0xff] }
  0xe7   : > { %vm409_vm8 = vcmp.gt.f32.partialorder %v2114_v1, 0.0  ;;  %v2388_v55 = vsel %vm2211_vm11, %v458_v39, -9e+15  ;;  %vm410_vm9 = vcmp.gt.f32.partialorder %v2117_v46, 0.0  ;;  %vm395_vm12 = vcmp.gt.f32.partialorder %v2207_v61, 0.0  ;;  %v887_v36 = vld [vmem:[%s2646_s3] sm:$0xff] }
  0xe8   : > { %v473_v2 = vsel %vm409_vm8, %v2114_v1, %v2141_v20  ;;  %732 = vmax.xlane.f32.xlu0 %v731_v33  ;;  %v710_v9 = vmax.f32 %v2383_v34, %v2388_v55  ;;  %v474_v42 = vsel %vm410_vm9, %v2117_v46, %v2144_v17  ;;  %vm396_vm10 = vcmp.gt.f32.partialorder %v2221_v14, 0.0  ;;  %v892_v1 = vld [vmem:[%s2646_s3 + $0x28] sm:$0xff]  ;;  %v907_v20 = vld [vmem:[%s2646_s3 + $0xa0] sm:$0xff] }
  0xe9   : > { %v2400_v56 = vsel %vm2226_vm13, %v473_v2, -9e+15  ;;  %v2414_v46 = vsel %vm2248_vm1, %v474_v42, -9e+15  ;;  %v459_v17 = vsel %vm395_vm12, %v2207_v61, %v2240_v12  ;;  %v460_v25 = vsel %vm396_vm10, %v2221_v14, %v2256_v44  ;;  %1252 = vmatpush3.msra.mxu0 %v892_v1  ;;  %1337 = vmatpush3.msra.mxu1 %v892_v1 }
  0xea   : > { %vm411_vm11 = vcmp.gt.f32.partialorder %v2168_v47, 0.0  ;;  %711 = vmax.xlane.f32.xlu1 %v710_v9  ;;  %v734_v32 = vmax.f32 %v2400_v56, %v2414_v46  ;;  %v2428_v18 = vsel %vm2267_vm6, %v459_v17, -9e+15  ;;  %v2432_v61 = vsel %vm2273_vm7, %v460_v25, -9e+15  ;;  %1253 = vmatprep.subr.mxu0 %v907_v20 }
  0xeb   : > { %vm412_vm13 = vcmp.gt.f32.partialorder %v2187_v8, 0.0  ;;  %v713_v44 = vmax.f32 %v2428_v18, %v2432_v61  ;;  %v475_v14 = vsel %vm411_vm11, %v2168_v47, %v2204_v63  ;;  %vm397_vm1 = vcmp.gt.f32.partialorder %v2319_v26, 0.0  ;;  %1254 = vmatpush3.msra.mxu0 %v891_v57  ;;  %1322 = vmatprep.subr.mxu1 %v907_v20 }
  0xec   : > { %v476_v12 = vsel %vm412_vm13, %v2187_v8, %v2218_v59  ;;  %735 = vmax.xlane.f32.xlu0 %v734_v32  ;;  %v2444_v5 = vsel %vm2303_vm0, %v475_v14, -9e+15  ;;  %vm398_vm6 = vcmp.gt.f32.partialorder %v2322_v10, 0.0  ;;  %v461_v47 = vsel %vm397_vm1, %v2319_v26, %v429_v35  ;;  %1255 = vmatprep.subr.mxu0 %v906_v4  ;;  %v889_v35 = vld [vmem:[%s2646_s3 + $0x10] sm:$0xff] }
  0xed   : > { %v2448_v45 = vsel %vm2309_vm2, %v476_v12, -9e+15  ;;  %v462_v8 = vsel %vm398_vm6, %v2322_v10, %v430_v13  ;;  %v2455_v63 = vsel %vm2326_vm3, %v461_v47, -9e+15  ;;  %vm413_vm7 = vcmp.gt.f32.partialorder %v2286_v49, 0.0  ;;  %1338 = vmatpush3.msra.mxu1 %v891_v57  ;;  %v2746_v47 = vld [vmem:[#allocation8_spill] sm:$0xff] }
  0xee   : > { %v2743_v59 = vunpack.c.1.s8 %v1925_v53  ;;  %714 = vmax.xlane.f32.xlu1 %v713_v44  ;;  %v737_v21 = vmax.f32 %v2444_v5, %v2448_v45  ;;  %v2468_v26 = vsel %vm2338_vm15, %v462_v8, -9e+15  ;;  %vm414_vm2 = vcmp.gt.f32.partialorder %v2299_v15, 0.0  ;;  %v890_v53 = vld [vmem:[%s2646_s3 + $0x18] sm:$0xff]  ;;  %1323 = vmatprep.subr.mxu1 %v906_v4 }
  0xef   : > { %v477_v10 = vsel %vm413_vm7, %v2286_v49, %v2316_v28  ;;  %v716_v16 = vmax.f32 %v2455_v63, %v2468_v26  ;;  %v478_v13 = vsel %vm414_vm2, %v2299_v15, %v2331_v51  ;;  %1256 = vmatpush3.msra.mxu0 %v890_v53  ;;  %v904_v28 = vld [vmem:[%s2646_s3 + $0x88] sm:$0xff]  ;;  %1339 = vmatpush3.msra.mxu1 %v890_v53 }
  0xf0   : > { %vm2460_vm0 = vcmp.ne.s32.totalorder %v2743_v59, 0  ;;  %v2488_v49 = vsel %vm2353_vm5, %v477_v10, -9e+15  ;;  %738 = vmax.xlane.f32.xlu0 %v737_v21  ;;  %1257 = vmatprep.subr.mxu0 %v905_v52  ;;  %v888_v51 = vld [vmem:[%s2646_s3 + $0x8] sm:$0xff]  ;;  %v2748_v10 = vld [vmem:[#allocation10_spill] sm:$0xff] }
  0xf1   : > { %v2495_v37 = vsel %vm2460_vm0, %v478_v13, -9e+15  ;;  %1258 = vmatpush3.msra.mxu0 %v889_v35  ;;  %1324 = vmatprep.subr.mxu1 %v905_v52 }
  0xf2   : > { %717 = vmax.xlane.f32.xlu1 %v716_v16  ;;  %v740_v15 = vmax.f32 %v2488_v49, %v2495_v37  ;;  %1259 = vmatprep.subr.mxu0 %v904_v28 }
  0xf3   : > { %1260 = vmatpush3.msra.mxu0 %v888_v51  ;;  %1340 = vmatpush3.msra.mxu1 %v889_v35 }
  0xf4   : > { %741 = vmax.xlane.f32.xlu0 %v740_v15  ;;  %1261 = vmatprep.subr.mxu0 %v903_v30 }
  0xf5   : > { %1262 = vmatpush3.msra.mxu0 %v887_v36  ;;  %1325 = vmatprep.subr.mxu1 %v904_v28 }
  0xf6   : > { %1341 = vmatpush3.msra.mxu1 %v888_v51 }
  0xf7   : > { %1326 = vmatprep.subr.mxu1 %v903_v30 }
  0xf8   : > { %1342 = vmatpush3.msra.mxu1 %v887_v36 }
 0x14f   : > { %v697_v6 = vpop.xlane.xlu0 %696 }
 0x150   : > { %v743_v58 = vsub.f32 %v1958_v48, %v697_v6  ;;  %v744_v11 = vsub.f32 %v1962_v43, %v697_v6 }
 0x152   : > { %v775_v50 = vmul.f32 1.442695, %v743_v58  ;;  %v777_v31 = vmul.f32 1.442695, %v744_v11 }
 0x153   : > { %v700_v33 = vpop.xlane.xlu0 %699 }
 0x154   : > { %1396 = vpow2.f32 %v775_v50  ;;  %v745_v39 = vsub.f32 %v1977_v27, %v700_v33  ;;  %v746_v2 = vsub.f32 %v1981_v54, %v700_v33 }
 0x155   : > { %1398 = vpow2.f32 %v777_v31 }
 0x156   : > { %v721_v9 = vpop.xlane.xlu1 %720  ;;  %v779_v42 = vmul.f32 1.442695, %v745_v39  ;;  %v781_v1 = vmul.f32 1.442695, %v746_v2 }
 0x157   : > { %v759_v20 = vsub.f32 %v2023_v7, %v721_v9  ;;  %v760_v57 = vsub.f32 %v2041_v0, %v721_v9 }
 0x158   : > { %1400 = vpow2.f32 %v779_v42 }
 0x159   : > { %v724_v48 = vpop.xlane.xlu0 %723  ;;  %v807_v17 = vmul.f32 1.442695, %v759_v20  ;;  %v809_v43 = vmul.f32 1.442695, %v760_v57  ;;  %1402 = vpow2.f32 %v781_v1 }
 0x15a   : > { %v761_v25 = vsub.f32 %v2045_v62, %v724_v48  ;;  %v762_v4 = vsub.f32 %v2076_v23, %v724_v48  ;;  %v2747_v62 = vld [vmem:[#allocation9_spill] sm:$0xff] }
 0x15b   : > { %1404 = vpow2.f32 %v807_v17 }
 0x15c   : > { %v703_v27 = vpop.xlane.xlu1 %702  ;;  %v811_v54 = vmul.f32 1.442695, %v761_v25  ;;  %1406 = vpow2.f32 %v809_v43  ;;  %v813_v7 = vmul.f32 1.442695, %v762_v4 }
 0x15d   : > { %v747_v32 = vsub.f32 %v2107_v24, %v703_v27  ;;  %v748_v44 = vsub.f32 %v2111_v38, %v703_v27  ;;  %v2749_v24 = vld [vmem:[#allocation11_spill] sm:$0xff] }
 0x15e   : > { %1408 = vpow2.f32 %v813_v7 }
 0x15f   : > { %v783_v14 = vmul.f32 1.442695, %v747_v32  ;;  %v785_v0 = vmul.f32 1.442695, %v748_v44  ;;  %1410 = vpow2.f32 %v811_v54 }
 0x161   : > { %v727_v12 = vpop.xlane.xlu0 %726  ;;  %1412 = vpow2.f32 %v783_v14  ;;  %v1397_v23 = vpop.eup %1396 }
 0x162   : > { %v763_v8 = vsub.f32 %v2746_v47, %v727_v12  ;;  %v764_v59 = vsub.f32 %v2747_v62, %v727_v12  ;;  %1414 = vpow2.f32 %v785_v0  ;;  %v1399_v21 = vpop.eup %1398 }
 0x163   : > { %v706_v3 = vpop.xlane.xlu1 %705  ;;  %983 = vmatprep.mubr.f32.mxu0 %v1399_v21  ;;  %v839_v16 = vadd.f32 %v1399_v21, %v1397_v23 }
 0x164   : > { %v749_v53 = vsub.f32 %v2748_v10, %v706_v3  ;;  %v750_v52 = vsub.f32 %v2749_v24, %v706_v3  ;;  %v815_v38 = vmul.f32 1.442695, %v763_v8  ;;  %v817_v35 = vmul.f32 1.442695, %v764_v59  ;;  %984 = vmatmul.mubr.f32.vlgmr.msra.gmra.mxu0 %v1397_v23 }
 0x165   : > { %v1401_v15 = vpop.eup %1400  ;;  %840 = vadd.xlane.f32.xlu1 %v839_v16 }
 0x166   : > { %v787_v13 = vmul.f32 1.442695, %v749_v53  ;;  %v789_v28 = vmul.f32 1.442695, %v750_v52  ;;  %1416 = vpow2.f32 %v815_v38  ;;  %v1403_v30 = vpop.eup %1402 }
 0x167   : > { %1418 = vpow2.f32 %v817_v35  ;;  %988 = vmatprep.mubr.f32.mxu0 %v1403_v30  ;;  %v842_v31 = vadd.f32 %v1403_v30, %v1401_v15 }
 0x168   : > { %1420 = vpow2.f32 %v787_v13  ;;  %v2526_v33 = vpop.eup %1404  ;;  %989 = vmatmul.mubr.f32.gmra.mxu0 %v1401_v15 }
 0x169   : > { %v730_v51 = vpop.xlane.xlu0 %729  ;;  %1422 = vpow2.f32 %v789_v28  ;;  %v2528_v2 = vpop.eup %1406  ;;  %843 = vadd.xlane.f32.xlu0 %v842_v31 }
 0x16a   : > { %v765_v6 = vsub.f32 %v2262_v29, %v730_v51  ;;  %v766_v58 = vsub.f32 %v2279_v41, %v730_v51  ;;  %1023 = vmatprep.mubr.f32.mxu1 %v2528_v2 }
 0x16b   : > { %v709_v36 = vpop.xlane.xlu1 %708  ;;  %v2531_v41 = vpop.eup %1408  ;;  %1024 = vmatmul.mubr.f32.vlgmr.msra.gmra.mxu1 %v2526_v33 }
 0x16c   : > { %v751_v11 = vsub.f32 %v2292_v40, %v709_v36  ;;  %v752_v50 = vsub.f32 %v2296_v22, %v709_v36  ;;  %v819_v39 = vmul.f32 1.442695, %v765_v6  ;;  %v821_v1 = vmul.f32 1.442695, %v766_v58  ;;  %v2536_v20 = vpop.eup %1410  ;;  %1028 = vmatprep.mubr.f32.mxu1 %v2531_v41 }
 0x16e   : > { %v791_v9 = vmul.f32 1.442695, %v751_v11  ;;  %v793_v42 = vmul.f32 1.442695, %v752_v50  ;;  %1424 = vpow2.f32 %v819_v39  ;;  %v1413_v48 = vpop.eup %1412 }
 0x16f   : > { %v1415_v4 = vpop.eup %1414  ;;  %1029 = vmatmul.mubr.f32.gmra.mxu1 %v2536_v20 }
 0x170   : > { %1426 = vpow2.f32 %v791_v9  ;;  %993 = vmatprep.mubr.f32.mxu0 %v1415_v4 }
 0x171   : > { %v733_v29 = vpop.xlane.xlu0 %732  ;;  %1428 = vpow2.f32 %v793_v42  ;;  %994 = vmatmul.mubr.f32.gmra.mxu0 %v1413_v48 }
 0x172   : > { %v767_v40 = vsub.f32 %v2365_v19, %v733_v29  ;;  %v768_v22 = vsub.f32 %v2369_v60, %v733_v29  ;;  %1430 = vpow2.f32 %v821_v1 }
 0x173   : > { %v712_v57 = vpop.xlane.xlu1 %711  ;;  %v2544_v14 = vpop.eup %1416 }
 0x174   : > { %v753_v17 = vsub.f32 %v2383_v34, %v712_v57  ;;  %v754_v43 = vsub.f32 %v2388_v55, %v712_v57  ;;  %v823_v25 = vmul.f32 1.442695, %v767_v40  ;;  %v825_v27 = vmul.f32 1.442695, %v768_v22  ;;  %v2548_v47 = vpop.eup %1418 }
 0x175   : > { %v736_v19 = vpop.xlane.xlu0 %735  ;;  %v845_v34 = vadd.f32 %v1415_v4, %v1413_v48  ;;  %v1421_v62 = vpop.eup %1420  ;;  %1033 = vmatprep.mubr.f32.mxu1 %v2548_v47  ;;  %v863_v57 = vadd.f32 %v2528_v2, %v2526_v33 }
 0x176   : > { %v795_v54 = vmul.f32 1.442695, %v753_v17  ;;  %v797_v60 = vmul.f32 1.442695, %v754_v43  ;;  %1432 = vpow2.f32 %v823_v25  ;;  %v769_v32 = vsub.f32 %v2400_v56, %v736_v19  ;;  %v1423_v3 = vpop.eup %1422  ;;  %1034 = vmatmul.mubr.f32.gmra.mxu1 %v2544_v14 }
 0x177   : > { %1434 = vpow2.f32 %v825_v27  ;;  %v715_v44 = vpop.xlane.xlu1 %714  ;;  %v770_v7 = vsub.f32 %v2414_v46, %v736_v19  ;;  %846 = vadd.xlane.f32.xlu1 %v845_v34  ;;  %998 = vmatprep.mubr.f32.mxu0 %v1423_v3  ;;  %v848_v52 = vadd.f32 %v1423_v3, %v1421_v62  ;;  %v866_v43 = vadd.f32 %v2536_v20, %v2531_v41 }
 0x178   : > { %1436 = vpow2.f32 %v795_v54  ;;  %v755_v55 = vsub.f32 %v2428_v18, %v715_v44  ;;  %v756_v0 = vsub.f32 %v2432_v61, %v715_v44  ;;  %v827_v12 = vmul.f32 1.442695, %v769_v32  ;;  %999 = vmatmul.mubr.f32.gmra.mxu0 %v1421_v62 }
 0x179   : > { %1438 = vpow2.f32 %v797_v60  ;;  %v829_v56 = vmul.f32 1.442695, %v770_v7  ;;  %v739_v8 = vpop.xlane.xlu0 %738  ;;  %849 = vadd.xlane.f32.xlu0 %v848_v52  ;;  %v869_v25 = vadd.f32 %v2548_v47, %v2544_v14 }
 0x17a   : > { %v799_v59 = vmul.f32 1.442695, %v755_v55  ;;  %v801_v23 = vmul.f32 1.442695, %v756_v0  ;;  %1440 = vpow2.f32 %v827_v12  ;;  %v771_v46 = vsub.f32 %v2444_v5, %v739_v8 }
 0x17b   : > { %1442 = vpow2.f32 %v829_v56  ;;  %v718_v18 = vpop.xlane.xlu1 %717  ;;  %v772_v61 = vsub.f32 %v2448_v45, %v739_v8  ;;  %v2556_v38 = vpop.eup %1424 }
 0x17c   : > { %1444 = vpow2.f32 %v799_v59  ;;  %v757_v21 = vsub.f32 %v2455_v63, %v718_v18  ;;  %v758_v10 = vsub.f32 %v2468_v26, %v718_v18  ;;  %v831_v53 = vmul.f32 1.442695, %v771_v46 }
 0x17d   : > { %1446 = vpow2.f32 %v801_v23  ;;  %v833_v24 = vmul.f32 1.442695, %v772_v61  ;;  %v742_v5 = vpop.xlane.xlu0 %741  ;;  %v1427_v13 = vpop.eup %1426 }
 0x17e   : > { %v803_v35 = vmul.f32 1.442695, %v757_v21  ;;  %v805_v16 = vmul.f32 1.442695, %v758_v10  ;;  %1448 = vpow2.f32 %v831_v53  ;;  %v773_v45 = vsub.f32 %v2488_v49, %v742_v5  ;;  %v1429_v26 = vpop.eup %1428 }
 0x17f   : > { %1450 = vpow2.f32 %v833_v24  ;;  %v774_v63 = vsub.f32 %v2495_v37, %v742_v5  ;;  %v1431_v15 = vpop.eup %1430  ;;  %1003 = vmatprep.mubr.f32.mxu0 %v1429_v26  ;;  %v851_v30 = vadd.f32 %v1429_v26, %v1427_v13 }
 0x180   : > { %1452 = vpow2.f32 %v803_v35  ;;  %v835_v28 = vmul.f32 1.442695, %v773_v45  ;;  %1038 = vmatprep.mubr.f32.mxu1 %v1431_v15  ;;  %1004 = vmatmul.mubr.f32.gmra.mxu0 %v1427_v13  ;;  %v872_v4 = vadd.f32 %v1431_v15, %v2556_v38 }
 0x181   : > { %1454 = vpow2.f32 %v805_v16  ;;  %v837_v51 = vmul.f32 1.442695, %v774_v63  ;;  %1039 = vmatmul.mubr.f32.gmra.mxu1 %v2556_v38  ;;  %852 = vadd.xlane.f32.xlu1 %v851_v30 }
 0x182   : > { %1456 = vpow2.f32 %v835_v28 }
 0x183   : > { %v1433_v36 = vpop.eup %1432  ;;  %1458 = vpow2.f32 %v837_v51 }
 0x184   : > { %v1435_v49 = vpop.eup %1434 }
 0x185   : > { %v1437_v6 = vpop.eup %1436  ;;  %1043 = vmatprep.mubr.f32.mxu1 %v1435_v49  ;;  %v875_v27 = vadd.f32 %v1435_v49, %v1433_v36 }
 0x186   : > { %v1439_v37 = vpop.eup %1438  ;;  %1044 = vmatmul.mubr.f32.gmra.mxu1 %v1433_v36 }
 0x187   : > { %v1441_v58 = vpop.eup %1440  ;;  %1008 = vmatprep.mubr.f32.mxu0 %v1439_v37  ;;  %v854_v11 = vadd.f32 %v1439_v37, %v1437_v6 }
 0x188   : > { %v1443_v50 = vpop.eup %1442  ;;  %1009 = vmatmul.mubr.f32.gmra.mxu0 %v1437_v6 }
 0x189   : > { %v1445_v31 = vpop.eup %1444  ;;  %855 = vadd.xlane.f32.xlu0 %v854_v11  ;;  %1048 = vmatprep.mubr.f32.mxu1 %v1443_v50  ;;  %v878_v33 = vadd.f32 %v1443_v50, %v1441_v58 }
 0x18a   : > { %v1447_v39 = vpop.eup %1446  ;;  %1049 = vmatmul.mubr.f32.gmra.mxu1 %v1441_v58 }
 0x18b   : > { %v1449_v9 = vpop.eup %1448  ;;  %1013 = vmatprep.mubr.f32.mxu0 %v1447_v39  ;;  %v857_v42 = vadd.f32 %v1447_v39, %v1445_v31 }
 0x18c   : > { %v1451_v1 = vpop.eup %1450  ;;  %1014 = vmatmul.mubr.f32.gmra.mxu0 %v1445_v31 }
 0x18d   : > { %v1453_v29 = vpop.eup %1452  ;;  %858 = vadd.xlane.f32.xlu1 %v857_v42  ;;  %1053 = vmatprep.mubr.f32.mxu1 %v1451_v1  ;;  %v881_v2 = vadd.f32 %v1451_v1, %v1449_v9 }
 0x18e   : > { %v1455_v40 = vpop.eup %1454  ;;  %1054 = vmatmul.mubr.f32.gmra.mxu1 %v1449_v9 }
 0x18f   : > { %v1457_v22 = vpop.eup %1456  ;;  %1018 = vmatprep.mubr.f32.mxu0 %v1455_v40  ;;  %v860_v48 = vadd.f32 %v1455_v40, %v1453_v29 }
 0x190   : > { %v1459_v17 = vpop.eup %1458  ;;  %1019 = vmatmul.mubr.f32.gmra.mxu0 %v1453_v29 }
 0x191   : > { %864 = vadd.xlane.f32.xlu1 %v863_v57  ;;  %861 = vadd.xlane.f32.xlu0 %v860_v48  ;;  %v884_v19 = vadd.f32 %v1459_v17, %v1457_v22 }
 0x192   : > { %1058 = vmatprep.mubr.f32.mxu1 %v1459_v17 }
 0x193   : > { %1059 = vmatmul.mubr.f32.gmra.mxu1 %v1457_v22 }
 0x195   : > { %867 = vadd.xlane.f32.xlu0 %v866_v43  ;;  %870 = vadd.xlane.f32.xlu1 %v869_v25 }
 0x199   : > { %873 = vadd.xlane.f32.xlu0 %v872_v4  ;;  %876 = vadd.xlane.f32.xlu1 %v875_v27 }
 0x19d   : > { %879 = vadd.xlane.f32.xlu0 %v878_v33  ;;  %882 = vadd.xlane.f32.xlu1 %v881_v2 }
 0x1a1   : > { %885 = vadd.xlane.f32.xlu0 %v884_v19 }
 0x1ee   : > { %v841_v54 = vpop.xlane.xlu1 %840 }
 0x1ef   : > { %1460 = vrcp.f32 %v841_v54 }
 0x1f2   : > { %v844_v60 = vpop.xlane.xlu0 %843 }
 0x1f3   : > { %1462 = vrcp.f32 %v844_v60 }
 0x1fc   : > { %v1461_v56 = vpop.eup %1460 }
 0x200   : > { %v847_v41 = vpop.xlane.xlu1 %846  ;;  %v1463_v18 = vpop.eup %1462 }
 0x202   : > { %v850_v20 = vpop.xlane.xlu0 %849 }
 0x20a   : > { %v853_v32 = vpop.xlane.xlu1 %852 }
 0x212   : > { %v856_v44 = vpop.xlane.xlu0 %855 }
 0x216   : > { %v2568_v7 = vpop.xlane.xlu1 %858 }
 0x21a   : > { %v2570_v34 = vpop.xlane.xlu0 %861  ;;  %v865_v14 = vpop.xlane.xlu1 %864 }
 0x21b   : > { %1464 = vrcp.f32 %v865_v14 }
 0x21e   : > { %v868_v55 = vpop.xlane.xlu0 %867  ;;  %v871_v8 = vpop.xlane.xlu1 %870 }
 0x21f   : > { %1466 = vrcp.f32 %v868_v55 }
 0x220   : > { %1468 = vrcp.f32 %v847_v41 }
 0x221   : > { %1470 = vrcp.f32 %v871_v8 }
 0x222   : > { %1472 = vrcp.f32 %v850_v20  ;;  %v874_v5 = vpop.xlane.xlu0 %873  ;;  %v877_v28 = vpop.xlane.xlu1 %876 }
 0x223   : > { %1474 = vrcp.f32 %v853_v32 }
 0x224   : > { %v1263_v0 = vpop.f32.mrf.mxu0  ;;  %1476 = vrcp.f32 %v874_v5 }
 0x225   : > { %1478 = vrcp.f32 %v877_v28 }
 0x226   : > { %v1264_v12 = vpop.f32.mrf.mxu0  ;;  %1480 = vrcp.f32 %v856_v44  ;;  %v880_v58 = vpop.xlane.xlu0 %879 }
 0x227   : > { %v1265_v47 = vadd.f32 %v1264_v12, %v1263_v0  ;;  %1482 = vrcp.f32 %v880_v58  ;;  %v883_v1 = vpop.xlane.xlu1 %882 }
 0x228   : > { %v1266_v62 = vpop.f32.mrf.mxu0  ;;  %v1465_v53 = vpop.eup %1464  ;;  %1484 = vrcp.f32 %v2568_v7 }
 0x229   : > { %v1080_v59 = vmul.f32 %v1461_v56, %v1265_v47  ;;  %1486 = vrcp.f32 %v883_v1 }
 0x22a   : > { %v1267_v23 = vpop.f32.mrf.mxu0  ;;  %1488 = vrcp.f32 %v2570_v34  ;;  %v886_v25 = vpop.xlane.xlu0 %885 }
 0x22b   : > { %1096 = vst [vmem:[%s2573_s5] sm:$0xff] %v1080_v59  ;;  %v1287_v46 = vpop.f32.mrf.mxu1  ;;  %v1268_v3 = vadd.f32 %v1267_v23, %v1266_v62  ;;  %1490 = vrcp.f32 %v886_v25 }
 0x22c   : > { %v1467_v13 = vpop.eup %1466 }
 0x22d   : > { %v1081_v61 = vmul.f32 %v1463_v18, %v1268_v3  ;;  %v1288_v21 = vpop.f32.mrf.mxu1  ;;  %v1469_v26 = vpop.eup %1468 }
 0x22e   : > { %v1289_v10 = vadd.f32 %v1288_v21, %v1287_v46  ;;  %v1471_v37 = vpop.eup %1470 }
 0x22f   : > { %1097 = vst [vmem:[%s2573_s5 + $0x8] sm:$0xff] %v1081_v61  ;;  %v1290_v24 = vpop.f32.mrf.mxu1  ;;  %v1473_v39 = vpop.eup %1472 }
 0x230   : > { %v1088_v52 = vmul.f32 %v1465_v53, %v1289_v10  ;;  %v1475_v48 = vpop.eup %1474 }
 0x231   : > { %v1269_v38 = vpop.f32.mrf.mxu0  ;;  %v1291_v35 = vpop.f32.mrf.mxu1 }
 0x232   : > { %1104 = vst [vmem:[%s2573_s5 + $0x40] sm:$0xff] %v1088_v52  ;;  %v1292_v45 = vadd.f32 %v1291_v35, %v1290_v24  ;;  %v1477_v43 = vpop.eup %1476 }
 0x233   : > { %v1270_v16 = vpop.f32.mrf.mxu0  ;;  %v1479_v41 = vpop.eup %1478 }
 0x234   : > { %v1271_v63 = vadd.f32 %v1270_v16, %v1269_v38  ;;  %v1089_v15 = vmul.f32 %v1467_v13, %v1292_v45  ;;  %v1481_v44 = vpop.eup %1480 }
 0x235   : > { %v1483_v47 = vpop.eup %1482 }
 0x236   : > { %v1293_v51 = vpop.f32.mrf.mxu1  ;;  %v1082_v30 = vmul.f32 %v1469_v26, %v1271_v63  ;;  %1105 = vst [vmem:[%s2573_s5 + $0x48] sm:$0xff] %v1089_v15  ;;  %v1485_v62 = vpop.eup %1484 }
 0x237   : > { %v1487_v21 = vpop.eup %1486 }
 0x238   : > { %v1272_v36 = vpop.f32.mrf.mxu0  ;;  %v1294_v49 = vpop.f32.mrf.mxu1  ;;  %1098 = vst [vmem:[%s2573_s5 + $0x10] sm:$0xff] %v1082_v30 }
 0x239   : > { %v1295_v6 = vadd.f32 %v1294_v49, %v1293_v51  ;;  %v1489_v24 = vpop.eup %1488 }
 0x23a   : > { %v1273_v11 = vpop.f32.mrf.mxu0  ;;  %v1491_v16 = vpop.eup %1490 }
 0x23b   : > { %v1274_v50 = vadd.f32 %v1273_v11, %v1272_v36  ;;  %v1090_v31 = vmul.f32 %v1471_v37, %v1295_v6 }
 0x23d   : > { %v1083_v9 = vmul.f32 %v1473_v39, %v1274_v50  ;;  %1106 = vst [vmem:[%s2573_s5 + $0x50] sm:$0xff] %v1090_v31 }
 0x23f   : > { %1099 = vst [vmem:[%s2573_s5 + $0x18] sm:$0xff] %v1083_v9 }
 0x240   : > { %v1275_v42 = vpop.f32.mrf.mxu0 }
 0x241   : > { %v1296_v29 = vpop.f32.mrf.mxu1 }
 0x242   : > { %v1276_v40 = vpop.f32.mrf.mxu0 }
 0x243   : > { %v1277_v22 = vadd.f32 %v1276_v40, %v1275_v42  ;;  %v1297_v57 = vpop.f32.mrf.mxu1 }
 0x244   : > { %v1298_v17 = vadd.f32 %v1297_v57, %v1296_v29 }
 0x245   : > { %v1084_v4 = vmul.f32 %v1475_v48, %v1277_v22 }
 0x246   : > { %v1299_v27 = vpop.f32.mrf.mxu1  ;;  %v1091_v33 = vmul.f32 %v1477_v43, %v1298_v17 }
 0x247   : > { %1100 = vst [vmem:[%s2573_s5 + $0x20] sm:$0xff] %v1084_v4 }
 0x248   : > { %v1278_v2 = vpop.f32.mrf.mxu0  ;;  %v1300_v19 = vpop.f32.mrf.mxu1  ;;  %1107 = vst [vmem:[%s2573_s5 + $0x58] sm:$0xff] %v1091_v33 }
 0x249   : > { %v1301_v60 = vadd.f32 %v1300_v19, %v1299_v27 }
 0x24a   : > { %v1279_v54 = vpop.f32.mrf.mxu0  ;;  %v1302_v32 = vpop.f32.mrf.mxu1 }
 0x24b   : > { %v1280_v20 = vadd.f32 %v1279_v54, %v1278_v2  ;;  %v1092_v7 = vmul.f32 %v1479_v41, %v1301_v60 }
 0x24c   : > { %v1281_v34 = vpop.f32.mrf.mxu0  ;;  %v1303_v55 = vpop.f32.mrf.mxu1 }
 0x24d   : > { %v1085_v14 = vmul.f32 %v1481_v44, %v1280_v20  ;;  %1108 = vst [vmem:[%s2573_s5 + $0x60] sm:$0xff] %v1092_v7  ;;  %v1304_v12 = vadd.f32 %v1303_v55, %v1302_v32 }
 0x24e   : > { %v1282_v0 = vpop.f32.mrf.mxu0  ;;  %v1305_v8 = vpop.f32.mrf.mxu1 }
 0x24f   : > { %1101 = vst [vmem:[%s2573_s5 + $0x28] sm:$0xff] %v1085_v14  ;;  %v1283_v56 = vadd.f32 %v1282_v0, %v1281_v34  ;;  %v1093_v59 = vmul.f32 %v1483_v47, %v1304_v12 }
 0x250   : > { %v1284_v23 = vpop.f32.mrf.mxu0  ;;  %v1306_v3 = vpop.f32.mrf.mxu1 }
 0x251   : > { %v1086_v46 = vmul.f32 %v1485_v62, %v1283_v56  ;;  %1109 = vst [vmem:[%s2573_s5 + $0x68] sm:$0xff] %v1093_v59  ;;  %v1307_v61 = vadd.f32 %v1306_v3, %v1305_v8 }
 0x252   : > { %v1285_v18 = vpop.f32.mrf.mxu0 }
 0x253   : > { %1102 = vst [vmem:[%s2573_s5 + $0x30] sm:$0xff] %v1086_v46  ;;  %v1286_v10 = vadd.f32 %v1285_v18, %v1284_v23  ;;  %v1308_v53 = vpop.f32.mrf.mxu1  ;;  %v1094_v5 = vmul.f32 %v1487_v21, %v1307_v61 }
 0x255   : > { %v1087_v52 = vmul.f32 %v1489_v24, %v1286_v10  ;;  %v1309_v38 = vpop.f32.mrf.mxu1  ;;  %1110 = vst [vmem:[%s2573_s5 + $0x70] sm:$0xff] %v1094_v5 }
 0x256   : > { %v1310_v35 = vadd.f32 %v1309_v38, %v1308_v53 }
 0x257   : > { %1103 = vst [vmem:[%s2573_s5 + $0x38] sm:$0xff] %v1087_v52 }
 0x258   : > { %v1095_v45 = vmul.f32 %v1491_v16, %v1310_v35 }
 0x25a   : > { %1111 = vst [vmem:[%s2573_s5 + $0x78] sm:$0xff] %v1095_v45 }
 0x25b   : > { %1533 = shalt.err (!%p1530_p0)
}
 0x25c   : > { %s1534_s12 = scalar_lea.hbm %s2597_s20, 2048  ;;  %s1538_s25 = scalar_lea.hbm %s2647_s4, 4096 }
 0x25d   : > { %p1535_p2 = scmp.ne.s32.totalorder %s2597_s20, %s1534_s12  ;;  %p1539_p3 = scmp.lt.s32.totalorder %s2597_s20, %s2647_s4 }
 0x25e   : > { %p1540_p6 = scmp.lt.s32.totalorder %s1538_s25, %s1534_s12 }
 0x25f   : > { %p1536_p9 = pnand %p1535_p2, %p2750_p13 }
 0x260   : > { %p1541_p11 = por %p1540_p6, %p1539_p3 }
 0x261   : > { %p1537_p1 = pneg %p1536_p9 }
 0x263   : > { %p1542_p12 = pnand %p1541_p11, %p1537_p1 }
 0x265   : > { %1545 = shalt.err (!%p1542_p12)
}
 0x266   : > { %s1591_s5 = smov 128   ;;  %s1592_s6 = smov 8  }
 0x267   : > { %1345 = dma.vmem_to_hbm [thread:$0]  (%p2750_p13), %s2599_s7, 2048, %s2597_s20, %s1113_s19, %s1591_s5, %s1591_s5, %s1592_s6  }
 0x268 PF: > { %s1141_s9 = sand.u32 1, %s1572_s15   ;;  %p2751_p4 = scmp.ne.s32.totalorder %s2657_s28, 0 }
 0x269   : > { %p2752_p5 = scmp.ge.s32.totalorder %s1584_s18, 2  ;;  %s1142_s14 = scalar_lea.sflag [#allocation4], %s1141_s9 }
 0x26b   : > { %p1352_p7 = pnand %p2752_p5, %p2751_p4 }
 0x26d   : > { %p1353_p8 = pneg %p1352_p7 }
 0x26f   : > { %1567 = dma.done.wait (%p1353_p8), %s1142_s14, 2048  }
 0x270   : > { %1569 = vsyncadd (%p1353_p8), %s1142_s14, 4294965248  ;;  %p17_p10 = scmp.ge.s32.totalorder %s1643_s21, 4   ;;  %s2753_s15 = smov %s1576_s16 }
 0x271   : > { %s2754_s16 = smov %s1580_s17  ;;  %s2755_s17 = smov %s1655_s24 }
 0x272   : > { %s2756_s18 = smov %s1643_s21  ;;  %19 = sbr.rel (!%p17_p10) target bundleno = 5 (0x5), region = 84 }
 0x277   :  { %1147 = vsyncpa [#allocation3], 1 }
 0x278   :  { %1149 = vsyncpa [#allocation3 + $0x1], 1 }
 0x279   :  { %1150 = vsyncpa [#allocation4], 1 }
 0x27a   :  { %1152 = vsyncpa [#allocation4 + $0x1], 1 }

</bundles_post_ra>
